<compile_context>
chip_gen: v5e
topology: v5e:2x2
jax: 0.10.0
libtpu: 0.0.40
codegen_flags: <defaults>
</compile_context>

<pallas_src>
import jax
import jax.numpy as jnp
import numpy as np
from jax.experimental import pallas as pl
from jax.experimental.pallas import tpu as pltpu


def _round_up(v, m):
    return (v + m - 1) // m * m


def _cdiv(a, b):
    return (a + b - 1) // b


def _make_dqn_kernel(NB, GH, GW, R1, R2, R3, D0, C1, OH3, OW3):
    """Builds the fused per-batch-tile kernel (all geometry is static)."""
    HWT = GH * GW

    def kernel(p_ref, w1_ref, b1_ref, w2_ref, b2_ref, w3_ref, b3_ref,
               f1w_ref, f1b_ref, f2w_ref, f2b_ref, o_ref):
        def mm(a_f32, w_bf16):
            # bf16 operands on the MXU, f32 accumulation.
            return jnp.dot(a_f32.astype(jnp.bfloat16), w_bf16,
                           preferred_element_type=jnp.float32)

        p_all = p_ref[0]                                    # (R0, 4*D0) f32

        # ---- conv1 (k8,s4): folded to a 2x2 stride-1 conv over the
        # space-to-depth(4) grid.  Computed per output parity quadrant (p,q)
        # so conv2's stride-2 becomes pure row offsets on the half grid.
        quads = []
        for p in range(2):
            for q in range(2):
                acc = None
                for KY in range(2):
                    for KX in range(2):
                        dY, r = divmod(p + KY, 2)
                        dX, s = divmod(q + KX, 2)
                        off = dY * GW + dX
                        lane0 = (r * 2 + s) * D0
                        a = p_all[off:off + R1, lane0:lane0 + D0]
                        t = mm(a, w1_ref[KY * 2 + KX])
                        acc = t if acc is None else acc + t
                quads.append(jnp.maximum(acc + b1_ref[...], 0.0))
        a2 = jnp.concatenate(quads, axis=-1)                # (R1, 4*C1) f32

        # ---- conv2 (k4,s2): folded to a 2x2 stride-1 conv on the half grid
        # with 4*C1 channels (quadrants lane-concatenated above).
        acc = None
        for KY in range(2):
            for KX in range(2):
                off = KY * GW + KX
                t = mm(a2[off:off + R2, :], w2_ref[KY * 2 + KX])
                acc = t if acc is None else acc + t
        a3 = jnp.maximum(acc + b2_ref[...], 0.0)            # (R2, C2) f32

        # ---- conv3 (k3,s1): plain shifted-slice accumulation.
        acc = None
        for ky in range(3):
            for kx in range(3):
                off = ky * GW + kx
                t = mm(a3[off:off + R3, :], w3_ref[ky * 3 + kx])
                acc = t if acc is None else acc + t
        a4 = jnp.maximum(acc + b3_ref[...], 0.0)            # (R3, C3) f32

        # ---- flatten: one row per sample in (h, w, c) lane order; fc1's
        # weight rows are permuted accordingly in the wrapper.
        rows = []
        for j in range(NB):
            pieces = []
            for y in range(OH3):
                for x in range(OW3):
                    r = j * HWT + y * GW + x
                    pieces.append(a4[r:r + 1, :])
            rows.append(pieces[0] if len(pieces) == 1
                        else jnp.concatenate(pieces, axis=-1))
        feats = rows[0] if NB == 1 else jnp.concatenate(rows, axis=0)  # (NB, F)

        # ---- NoisyLinear 1 (+ReLU) and 2.  Effective weights (w + sigma*eps)
        # were precomputed in the wrapper; bias add / ReLU stay f32.
        h = jnp.maximum(mm(feats, f1w_ref[...]) + f1b_ref[...], 0.0)
        o_ref[0] = mm(h, f2w_ref[...]) + f2b_ref[...]

    return kernel


def dqn_forward(x_nchw, params, noise, *, batch_tile=1):
    """Fused Pallas DQN forward.  Grid = batch tiles (parallel); weights resident."""
    N, Cin, H, W = x_nchw.shape
    C1 = params["w1"].shape[0]
    C2 = params["w2"].shape[0]
    C3 = params["w3"].shape[0]
    n_fc1 = params["fc1_w"].shape[0]
    n_actions = params["fc2_w"].shape[0]

    assert H % 4 == 0 and W % 4 == 0, "input spatial dims must be divisible by 4"
    Hs, Ws = H // 4, W // 4
    OH1, OW1 = Hs - 1, Ws - 1                   # conv1 output (k8, s4)
    assert OH1 % 2 == 0 and OW1 % 2 == 0, "stride-2 folding needs even conv1 output"
    OH2, OW2 = OH1 // 2 - 1, OW1 // 2 - 1       # conv2 output (k4, s2)
    OH3, OW3 = OH2 - 2, OW2 - 2                 # conv3 output (k3, s1)
    assert OH3 >= 1 and OW3 >= 1, "input too small for the conv stack"
    conv_out = C3 * OH3 * OW3
    assert params["fc1_w"].shape[1] == conv_out

    D0 = 16 * Cin                               # channels after space-to-depth(4)
    GH, GW = (Hs + 1) // 2, (Ws + 1) // 2       # parity (half) grid
    HWT = GH * GW                               # row pitch per image

    NB = max(1, min(batch_tile, N))             # images per grid step
    n_tiles = _cdiv(N, NB)
    Np = n_tiles * NB

    # Row budgets: every conv keeps its input's row pitch, so a kernel tap is a
    # pure row offset; the per-stage max offsets below keep all slices in
    # bounds and guarantee valid rows never read garbage.
    R3 = NB * HWT                               # conv3 output rows per tile
    R2 = R3 + 2 * GW + 2                        # conv3 taps reach <= 2*GW+2
    R1 = R2 + GW + 1                            # conv2 taps reach <= GW+1
    R0 = _round_up(R1 + GW + 1, 8)              # conv1 taps reach <= GW+1
    L0 = _round_up(4 * D0, 128)                 # lane width of the parity input
    na_pad = _round_up(n_actions, 128)          # lane-dense output width

    # --- input: NCHW -> NHWC -> space-to-depth(4) -> parity split(2) --------
    x = jnp.transpose(x_nchw, (0, 2, 3, 1))
    if Np > N:
        x = jnp.pad(x, ((0, Np - N), (0, 0), (0, 0), (0, 0)))
    x = x.reshape(Np, Hs, 4, Ws, 4, Cin).transpose(0, 1, 3, 2, 4, 5)
    s2d = x.reshape(Np, Hs, Ws, D0)
    s2d = jnp.pad(s2d, ((0, 0), (0, 2 * GH - Hs), (0, 2 * GW - Ws), (0, 0)))
    p_all = s2d.reshape(Np, GH, 2, GW, 2, D0).transpose(0, 1, 3, 2, 4, 5)
    p_all = p_all.reshape(n_tiles, NB * HWT, 4 * D0)
    p_all = jnp.pad(p_all, ((0, 0), (0, R0 - NB * HWT), (0, L0 - 4 * D0)))

    # --- conv weights as per-tap (K, Cout) bf16 matrices ----------------------
    w1 = params["w1"].reshape(C1, Cin, 2, 4, 2, 4)                  # co,c,KY,a,KX,b
    w1m = jnp.transpose(w1, (2, 4, 3, 5, 1, 0)).reshape(4, D0, C1).astype(jnp.bfloat16)
    w2 = params["w2"].reshape(C2, C1, 2, 2, 2, 2)                   # co,c,KY,p,KX,q
    w2m = jnp.transpose(w2, (2, 4, 3, 5, 1, 0)).reshape(4, 4 * C1, C2).astype(jnp.bfloat16)
    w3m = jnp.transpose(params["w3"], (2, 3, 1, 0)).reshape(9, C2, C3).astype(jnp.bfloat16)
    b1 = params["b1"].reshape(1, C1)
    b2 = params["b2"].reshape(1, C2)
    b3 = params["b3"].reshape(1, C3)

    # --- NoisyLinear effective weights, precomputed / permuted / padded ------
    perm = np.arange(conv_out).reshape(C3, OH3, OW3).transpose(1, 2, 0).reshape(-1)
    f1w = ((params["fc1_w"] + params["fc1_sw"] * noise["ew1"]).T[perm]).astype(jnp.bfloat16)
    f1b = (params["fc1_b"] + params["fc1_sb"] * noise["eb1"]).reshape(1, n_fc1)
    pad_c = ((0, 0), (0, na_pad - n_actions))
    f2w = jnp.pad((params["fc2_w"] + params["fc2_sw"] * noise["ew2"]).T,
                  pad_c).astype(jnp.bfloat16)
    f2b = jnp.pad((params["fc2_b"] + params["fc2_sb"] * noise["eb2"]).reshape(1, n_actions),
                  pad_c)

    kernel = _make_dqn_kernel(NB, GH, GW, R1, R2, R3, D0, C1, OH3, OW3)
    args = (p_all, w1m, b1, w2m, b2, w3m, b3, f1w, f1b, f2w, f2b)

    def _const_spec(a):
        n = a.ndim
        return pl.BlockSpec(a.shape, lambda i: (0,) * n)   # VMEM-resident weights

    in_specs = [pl.BlockSpec((1, R0, L0), lambda i: (i, 0, 0))] + \
               [_const_spec(a) for a in args[1:]]
    out_specs = pl.BlockSpec((1, NB, na_pad), lambda i: (i, 0, 0))

    # Explicit VMEM budget (v7x: 64 MiB/TC; default scoped limit 16-32 MiB).
    def _nbytes(a):
        return int(np.prod(a.shape)) * a.dtype.itemsize
    weight_bytes = sum(_nbytes(a) for a in args[1:])
    tile_bytes = R0 * L0 * 4 + NB * na_pad * 4
    act_bytes = 4 * (R1 * L0 + R1 * 4 * C1 + R2 * C2 + R3 * C3)
    vmem_limit = int(min(96 * 2 ** 20,
                         2 * (weight_bytes + 2 * tile_bytes + act_bytes) + (8 << 20)))

    flops_tile = 2 * (16 * R1 * D0 * C1 + 4 * R2 * 4 * C1 * C2 + 9 * R3 * C2 * C3
                      + NB * conv_out * n_fc1 + NB * n_fc1 * na_pad)
    cost = pl.CostEstimate(flops=int(flops_tile * n_tiles), transcendentals=0,
                           bytes_accessed=int(_nbytes(p_all) + weight_bytes
                                              + n_tiles * NB * na_pad * 4))

    out = pl.pallas_call(
        kernel,
        out_shape=jax.ShapeDtypeStruct((n_tiles, NB, na_pad), jnp.float32),
        grid=(n_tiles,),
        in_specs=in_specs,
        out_specs=out_specs,
        compiler_params=pltpu.CompilerParams(
            dimension_semantics=("parallel",),
            vmem_limit_bytes=vmem_limit),
        cost_estimate=cost,
    )(*args)

    return out.reshape(Np, na_pad)[:N, :n_actions]


def reference_forward(x_nchw, params, noise):
    """Pure-JAX f32 reference for correctness checking."""
    a = x_nchw
    for (w, b, s) in [(params["w1"], params["b1"], 4),
                      (params["w2"], params["b2"], 2),
                      (params["w3"], params["b3"], 1)]:
        a = jax.lax.conv_general_dilated(
            a, w, (s, s), "VALID", dimension_numbers=("NCHW", "OIHW", "NCHW"))
        a = jax.nn.relu(a + b[None, :, None, None])
    a = a.reshape(a.shape[0], -1)
    w_eff = params["fc1_w"] + params["fc1_sw"] * noise["ew1"]
    b_eff = params["fc1_b"] + params["fc1_sb"] * noise["eb1"]
    a = jax.nn.relu(a @ w_eff.T + b_eff)
    w_eff = params["fc2_w"] + params["fc2_sw"] * noise["ew2"]
    b_eff = params["fc2_b"] + params["fc2_sb"] * noise["eb2"]
    return a @ w_eff.T + b_eff


if __name__ == "__main__":
    # Smallest spatial size surviving k8/s4 -> k4/s2 -> k3/s1 is 36.
    N, C, H, W = 2, 4, 36, 36
    n_actions = 4
    sigma_init = 0.017

    key = jax.random.PRNGKey(0)
    ks = jax.random.split(key, 16)

    x = jax.random.normal(ks[0], (N, C, H, W), dtype=jnp.float32)

    conv_out = 64 * 1 * 1  # (36 -> 8 -> 3 -> 1 spatial), 64 channels

    params = {
        "w1": 0.05 * jax.random.normal(ks[1], (32, C, 8, 8), jnp.float32),
        "b1": 0.05 * jax.random.normal(ks[2], (32,), jnp.float32),
        "w2": 0.05 * jax.random.normal(ks[3], (64, 32, 4, 4), jnp.float32),
        "b2": 0.05 * jax.random.normal(ks[4], (64,), jnp.float32),
        "w3": 0.05 * jax.random.normal(ks[5], (64, 64, 3, 3), jnp.float32),
        "b3": 0.05 * jax.random.normal(ks[6], (64,), jnp.float32),
        "fc1_w": 0.05 * jax.random.normal(ks[7], (512, conv_out), jnp.float32),
        "fc1_b": 0.05 * jax.random.normal(ks[8], (512,), jnp.float32),
        "fc1_sw": jnp.full((512, conv_out), sigma_init, jnp.float32),
        "fc1_sb": jnp.full((512,), sigma_init, jnp.float32),
        "fc2_w": 0.05 * jax.random.normal(ks[9], (n_actions, 512), jnp.float32),
        "fc2_b": 0.05 * jax.random.normal(ks[10], (n_actions,), jnp.float32),
        "fc2_sw": jnp.full((n_actions, 512), sigma_init, jnp.float32),
        "fc2_sb": jnp.full((n_actions,), sigma_init, jnp.float32),
    }
    # TODO(synk): PyTorch's NoisyLinear resamples epsilon with .normal_() every
    # forward; here the draws are deterministic inputs so the pure-JAX
    # reference stays comparable (an in-kernel pltpu PRNG would diverge).
    noise = {
        "ew1": jax.random.normal(ks[11], (512, conv_out), jnp.float32),
        "eb1": jax.random.normal(ks[12], (512,), jnp.float32),
        "ew2": jax.random.normal(ks[13], (n_actions, 512), jnp.float32),
        "eb2": jax.random.normal(ks[14], (n_actions,), jnp.float32),
    }

    fwd = jax.jit(dqn_forward)
    out = jax.block_until_ready(fwd(x, params, noise))
    ref = jax.block_until_ready(reference_forward(x, params, noise))

    assert out.shape == (N, n_actions), out.shape
    np.testing.assert_allclose(np.asarray(out), np.asarray(ref),
                               rtol=2e-2, atol=2e-2)
    print("KERNEL_OK")
</pallas_src>

<mosaic_0001>
module attributes {stable_mosaic.version = 11 : i64} {
  func.func @kernel(%arg0: i32, %arg1: memref<1x56x256xf32, #tpu.memory_space<vmem>>, %arg2: memref<4x64x32xbf16, #tpu.memory_space<vmem>>, %arg3: memref<1x32xf32, #tpu.memory_space<vmem>>, %arg4: memref<4x128x64xbf16, #tpu.memory_space<vmem>>, %arg5: memref<1x64xf32, #tpu.memory_space<vmem>>, %arg6: memref<9x64x64xbf16, #tpu.memory_space<vmem>>, %arg7: memref<1x64xf32, #tpu.memory_space<vmem>>, %arg8: memref<64x512xbf16, #tpu.memory_space<vmem>>, %arg9: memref<1x512xf32, #tpu.memory_space<vmem>>, %arg10: memref<512x128xbf16, #tpu.memory_space<vmem>>, %arg11: memref<1x128xf32, #tpu.memory_space<vmem>>, %arg12: memref<1x1x128xf32, #tpu.memory_space<vmem>>) attributes {dimension_semantics = [#tpu.dimension_semantics<parallel>], iteration_bounds = array<i64: 2>, scalar_prefetch = 0 : i64, scratch_operands = 0 : i64, tpu.core_type = #tpu.core_type<tc>, window_params = [{transform_indices = @transform_0, window_bounds = array<i64: 1, 56, 256>}, {pipeline_mode = #tpu.pipeline_mode<synchronous>, transform_indices = @transform_1, window_bounds = array<i64: 4, 64, 32>}, {pipeline_mode = #tpu.pipeline_mode<synchronous>, transform_indices = @transform_2, window_bounds = array<i64: 1, 32>}, {pipeline_mode = #tpu.pipeline_mode<synchronous>, transform_indices = @transform_3, window_bounds = array<i64: 4, 128, 64>}, {pipeline_mode = #tpu.pipeline_mode<synchronous>, transform_indices = @transform_4, window_bounds = array<i64: 1, 64>}, {pipeline_mode = #tpu.pipeline_mode<synchronous>, transform_indices = @transform_5, window_bounds = array<i64: 9, 64, 64>}, {pipeline_mode = #tpu.pipeline_mode<synchronous>, transform_indices = @transform_6, window_bounds = array<i64: 1, 64>}, {pipeline_mode = #tpu.pipeline_mode<synchronous>, transform_indices = @transform_7, window_bounds = array<i64: 64, 512>}, {pipeline_mode = #tpu.pipeline_mode<synchronous>, transform_indices = @transform_8, window_bounds = array<i64: 1, 512>}, {pipeline_mode = #tpu.pipeline_mode<synchronous>, transform_indices = @transform_9, window_bounds = array<i64: 512, 128>}, {pipeline_mode = #tpu.pipeline_mode<synchronous>, transform_indices = @transform_10, window_bounds = array<i64: 1, 128>}, {transform_indices = @transform_11, window_bounds = array<i64: 1, 1, 128>}]} {
    %c0 = arith.constant 0 : index
    %c0_0 = arith.constant 0 : index
    %c0_1 = arith.constant 0 : index
    %0 = vector.load %arg1[%c0, %c0_0, %c0_1] : memref<1x56x256xf32, #tpu.memory_space<vmem>>, vector<1x56x256xf32>
    %1 = vector.shape_cast %0 : vector<1x56x256xf32> to vector<56x256xf32>
    %2 = vector.extract_strided_slice %1 {offsets = [0, 0], sizes = [43, 64], strides = [1, 1]} : vector<56x256xf32> to vector<43x64xf32>
    %c0_2 = arith.constant 0 : index
    %c0_3 = arith.constant 0 : index
    %c0_4 = arith.constant 0 : index
    %3 = vector.load %arg2[%c0_2, %c0_3, %c0_4] : memref<4x64x32xbf16, #tpu.memory_space<vmem>>, vector<1x64x32xbf16>
    %4 = vector.shape_cast %3 : vector<1x64x32xbf16> to vector<64x32xbf16>
    %5 = arith.truncf %2 : vector<43x64xf32> to vector<43x64xbf16>
    %cst = arith.constant dense<0.000000e+00> : vector<43x32xf32>
    %6 = tpu.matmul %5, %4, %cst {dimension_numbers = #tpu.dot_dimension_numbers<[1], [0], [0], [1], [0, 0, 1, 1], [], []>} : vector<43x64xbf16>, vector<64x32xbf16>, vector<43x32xf32> -> vector<43x32xf32>
    %7 = vector.extract_strided_slice %1 {offsets = [0, 64], sizes = [43, 64], strides = [1, 1]} : vector<56x256xf32> to vector<43x64xf32>
    %c1 = arith.constant 1 : index
    %c0_5 = arith.constant 0 : index
    %c0_6 = arith.constant 0 : index
    %8 = vector.load %arg2[%c1, %c0_5, %c0_6] : memref<4x64x32xbf16, #tpu.memory_space<vmem>>, vector<1x64x32xbf16>
    %9 = vector.shape_cast %8 : vector<1x64x32xbf16> to vector<64x32xbf16>
    %10 = arith.truncf %7 : vector<43x64xf32> to vector<43x64xbf16>
    %cst_7 = arith.constant dense<0.000000e+00> : vector<43x32xf32>
    %11 = tpu.matmul %10, %9, %cst_7 {dimension_numbers = #tpu.dot_dimension_numbers<[1], [0], [0], [1], [0, 0, 1, 1], [], []>} : vector<43x64xbf16>, vector<64x32xbf16>, vector<43x32xf32> -> vector<43x32xf32>
    %12 = arith.addf %6, %11 : vector<43x32xf32>
    %13 = vector.extract_strided_slice %1 {offsets = [0, 128], sizes = [43, 64], strides = [1, 1]} : vector<56x256xf32> to vector<43x64xf32>
    %c2 = arith.constant 2 : index
    %c0_8 = arith.constant 0 : index
    %c0_9 = arith.constant 0 : index
    %14 = vector.load %arg2[%c2, %c0_8, %c0_9] : memref<4x64x32xbf16, #tpu.memory_space<vmem>>, vector<1x64x32xbf16>
    %15 = vector.shape_cast %14 : vector<1x64x32xbf16> to vector<64x32xbf16>
    %16 = arith.truncf %13 : vector<43x64xf32> to vector<43x64xbf16>
    %cst_10 = arith.constant dense<0.000000e+00> : vector<43x32xf32>
    %17 = tpu.matmul %16, %15, %cst_10 {dimension_numbers = #tpu.dot_dimension_numbers<[1], [0], [0], [1], [0, 0, 1, 1], [], []>} : vector<43x64xbf16>, vector<64x32xbf16>, vector<43x32xf32> -> vector<43x32xf32>
    %18 = arith.addf %12, %17 : vector<43x32xf32>
    %19 = vector.extract_strided_slice %1 {offsets = [0, 192], sizes = [43, 64], strides = [1, 1]} : vector<56x256xf32> to vector<43x64xf32>
    %c3 = arith.constant 3 : index
    %c0_11 = arith.constant 0 : index
    %c0_12 = arith.constant 0 : index
    %20 = vector.load %arg2[%c3, %c0_11, %c0_12] : memref<4x64x32xbf16, #tpu.memory_space<vmem>>, vector<1x64x32xbf16>
    %21 = vector.shape_cast %20 : vector<1x64x32xbf16> to vector<64x32xbf16>
    %22 = arith.truncf %19 : vector<43x64xf32> to vector<43x64xbf16>
    %cst_13 = arith.constant dense<0.000000e+00> : vector<43x32xf32>
    %23 = tpu.matmul %22, %21, %cst_13 {dimension_numbers = #tpu.dot_dimension_numbers<[1], [0], [0], [1], [0, 0, 1, 1], [], []>} : vector<43x64xbf16>, vector<64x32xbf16>, vector<43x32xf32> -> vector<43x32xf32>
    %24 = arith.addf %18, %23 : vector<43x32xf32>
    %c0_14 = arith.constant 0 : index
    %c0_15 = arith.constant 0 : index
    %25 = vector.load %arg3[%c0_14, %c0_15] : memref<1x32xf32, #tpu.memory_space<vmem>>, vector<1x32xf32>
    %26 = vector.broadcast %25 : vector<1x32xf32> to vector<43x32xf32>
    %27 = arith.addf %24, %26 : vector<43x32xf32>
    %cst_16 = arith.constant 0.000000e+00 : f32
    %28 = vector.broadcast %cst_16 : f32 to vector<43x32xf32>
    %29 = arith.maximumf %27, %28 : vector<43x32xf32>
    %30 = vector.extract_strided_slice %1 {offsets = [0, 64], sizes = [43, 64], strides = [1, 1]} : vector<56x256xf32> to vector<43x64xf32>
    %c0_17 = arith.constant 0 : index
    %c0_18 = arith.constant 0 : index
    %c0_19 = arith.constant 0 : index
    %31 = vector.load %arg2[%c0_17, %c0_18, %c0_19] : memref<4x64x32xbf16, #tpu.memory_space<vmem>>, vector<1x64x32xbf16>
    %32 = vector.shape_cast %31 : vector<1x64x32xbf16> to vector<64x32xbf16>
    %33 = arith.truncf %30 : vector<43x64xf32> to vector<43x64xbf16>
    %cst_20 = arith.constant dense<0.000000e+00> : vector<43x32xf32>
    %34 = tpu.matmul %33, %32, %cst_20 {dimension_numbers = #tpu.dot_dimension_numbers<[1], [0], [0], [1], [0, 0, 1, 1], [], []>} : vector<43x64xbf16>, vector<64x32xbf16>, vector<43x32xf32> -> vector<43x32xf32>
    %35 = vector.extract_strided_slice %1 {offsets = [1, 0], sizes = [43, 64], strides = [1, 1]} : vector<56x256xf32> to vector<43x64xf32>
    %c1_21 = arith.constant 1 : index
    %c0_22 = arith.constant 0 : index
    %c0_23 = arith.constant 0 : index
    %36 = vector.load %arg2[%c1_21, %c0_22, %c0_23] : memref<4x64x32xbf16, #tpu.memory_space<vmem>>, vector<1x64x32xbf16>
    %37 = vector.shape_cast %36 : vector<1x64x32xbf16> to vector<64x32xbf16>
    %38 = arith.truncf %35 : vector<43x64xf32> to vector<43x64xbf16>
    %cst_24 = arith.constant dense<0.000000e+00> : vector<43x32xf32>
    %39 = tpu.matmul %38, %37, %cst_24 {dimension_numbers = #tpu.dot_dimension_numbers<[1], [0], [0], [1], [0, 0, 1, 1], [], []>} : vector<43x64xbf16>, vector<64x32xbf16>, vector<43x32xf32> -> vector<43x32xf32>
    %40 = arith.addf %34, %39 : vector<43x32xf32>
    %41 = vector.extract_strided_slice %1 {offsets = [0, 192], sizes = [43, 64], strides = [1, 1]} : vector<56x256xf32> to vector<43x64xf32>
    %c2_25 = arith.constant 2 : index
    %c0_26 = arith.constant 0 : index
    %c0_27 = arith.constant 0 : index
    %42 = vector.load %arg2[%c2_25, %c0_26, %c0_27] : memref<4x64x32xbf16, #tpu.memory_space<vmem>>, vector<1x64x32xbf16>
    %43 = vector.shape_cast %42 : vector<1x64x32xbf16> to vector<64x32xbf16>
    %44 = arith.truncf %41 : vector<43x64xf32> to vector<43x64xbf16>
    %cst_28 = arith.constant dense<0.000000e+00> : vector<43x32xf32>
    %45 = tpu.matmul %44, %43, %cst_28 {dimension_numbers = #tpu.dot_dimension_numbers<[1], [0], [0], [1], [0, 0, 1, 1], [], []>} : vector<43x64xbf16>, vector<64x32xbf16>, vector<43x32xf32> -> vector<43x32xf32>
    %46 = arith.addf %40, %45 : vector<43x32xf32>
    %47 = vector.extract_strided_slice %1 {offsets = [1, 128], sizes = [43, 64], strides = [1, 1]} : vector<56x256xf32> to vector<43x64xf32>
    %c3_29 = arith.constant 3 : index
    %c0_30 = arith.constant 0 : index
    %c0_31 = arith.constant 0 : index
    %48 = vector.load %arg2[%c3_29, %c0_30, %c0_31] : memref<4x64x32xbf16, #tpu.memory_space<vmem>>, vector<1x64x32xbf16>
    %49 = vector.shape_cast %48 : vector<1x64x32xbf16> to vector<64x32xbf16>
    %50 = arith.truncf %47 : vector<43x64xf32> to vector<43x64xbf16>
    %cst_32 = arith.constant dense<0.000000e+00> : vector<43x32xf32>
    %51 = tpu.matmul %50, %49, %cst_32 {dimension_numbers = #tpu.dot_dimension_numbers<[1], [0], [0], [1], [0, 0, 1, 1], [], []>} : vector<43x64xbf16>, vector<64x32xbf16>, vector<43x32xf32> -> vector<43x32xf32>
    %52 = arith.addf %46, %51 : vector<43x32xf32>
    %c0_33 = arith.constant 0 : index
    %c0_34 = arith.constant 0 : index
    %53 = vector.load %arg3[%c0_33, %c0_34] : memref<1x32xf32, #tpu.memory_space<vmem>>, vector<1x32xf32>
    %54 = vector.broadcast %53 : vector<1x32xf32> to vector<43x32xf32>
    %55 = arith.addf %52, %54 : vector<43x32xf32>
    %cst_35 = arith.constant 0.000000e+00 : f32
    %56 = vector.broadcast %cst_35 : f32 to vector<43x32xf32>
    %57 = arith.maximumf %55, %56 : vector<43x32xf32>
    %58 = vector.extract_strided_slice %1 {offsets = [0, 128], sizes = [43, 64], strides = [1, 1]} : vector<56x256xf32> to vector<43x64xf32>
    %c0_36 = arith.constant 0 : index
    %c0_37 = arith.constant 0 : index
    %c0_38 = arith.constant 0 : index
    %59 = vector.load %arg2[%c0_36, %c0_37, %c0_38] : memref<4x64x32xbf16, #tpu.memory_space<vmem>>, vector<1x64x32xbf16>
    %60 = vector.shape_cast %59 : vector<1x64x32xbf16> to vector<64x32xbf16>
    %61 = arith.truncf %58 : vector<43x64xf32> to vector<43x64xbf16>
    %cst_39 = arith.constant dense<0.000000e+00> : vector<43x32xf32>
    %62 = tpu.matmul %61, %60, %cst_39 {dimension_numbers = #tpu.dot_dimension_numbers<[1], [0], [0], [1], [0, 0, 1, 1], [], []>} : vector<43x64xbf16>, vector<64x32xbf16>, vector<43x32xf32> -> vector<43x32xf32>
    %63 = vector.extract_strided_slice %1 {offsets = [0, 192], sizes = [43, 64], strides = [1, 1]} : vector<56x256xf32> to vector<43x64xf32>
    %c1_40 = arith.constant 1 : index
    %c0_41 = arith.constant 0 : index
    %c0_42 = arith.constant 0 : index
    %64 = vector.load %arg2[%c1_40, %c0_41, %c0_42] : memref<4x64x32xbf16, #tpu.memory_space<vmem>>, vector<1x64x32xbf16>
    %65 = vector.shape_cast %64 : vector<1x64x32xbf16> to vector<64x32xbf16>
    %66 = arith.truncf %63 : vector<43x64xf32> to vector<43x64xbf16>
    %cst_43 = arith.constant dense<0.000000e+00> : vector<43x32xf32>
    %67 = tpu.matmul %66, %65, %cst_43 {dimension_numbers = #tpu.dot_dimension_numbers<[1], [0], [0], [1], [0, 0, 1, 1], [], []>} : vector<43x64xbf16>, vector<64x32xbf16>, vector<43x32xf32> -> vector<43x32xf32>
    %68 = arith.addf %62, %67 : vector<43x32xf32>
    %69 = vector.extract_strided_slice %1 {offsets = [5, 0], sizes = [43, 64], strides = [1, 1]} : vector<56x256xf32> to vector<43x64xf32>
    %c2_44 = arith.constant 2 : index
    %c0_45 = arith.constant 0 : index
    %c0_46 = arith.constant 0 : index
    %70 = vector.load %arg2[%c2_44, %c0_45, %c0_46] : memref<4x64x32xbf16, #tpu.memory_space<vmem>>, vector<1x64x32xbf16>
    %71 = vector.shape_cast %70 : vector<1x64x32xbf16> to vector<64x32xbf16>
    %72 = arith.truncf %69 : vector<43x64xf32> to vector<43x64xbf16>
    %cst_47 = arith.constant dense<0.000000e+00> : vector<43x32xf32>
    %73 = tpu.matmul %72, %71, %cst_47 {dimension_numbers = #tpu.dot_dimension_numbers<[1], [0], [0], [1], [0, 0, 1, 1], [], []>} : vector<43x64xbf16>, vector<64x32xbf16>, vector<43x32xf32> -> vector<43x32xf32>
    %74 = arith.addf %68, %73 : vector<43x32xf32>
    %75 = vector.extract_strided_slice %1 {offsets = [5, 64], sizes = [43, 64], strides = [1, 1]} : vector<56x256xf32> to vector<43x64xf32>
    %c3_48 = arith.constant 3 : index
    %c0_49 = arith.constant 0 : index
    %c0_50 = arith.constant 0 : index
    %76 = vector.load %arg2[%c3_48, %c0_49, %c0_50] : memref<4x64x32xbf16, #tpu.memory_space<vmem>>, vector<1x64x32xbf16>
    %77 = vector.shape_cast %76 : vector<1x64x32xbf16> to vector<64x32xbf16>
    %78 = arith.truncf %75 : vector<43x64xf32> to vector<43x64xbf16>
    %cst_51 = arith.constant dense<0.000000e+00> : vector<43x32xf32>
    %79 = tpu.matmul %78, %77, %cst_51 {dimension_numbers = #tpu.dot_dimension_numbers<[1], [0], [0], [1], [0, 0, 1, 1], [], []>} : vector<43x64xbf16>, vector<64x32xbf16>, vector<43x32xf32> -> vector<43x32xf32>
    %80 = arith.addf %74, %79 : vector<43x32xf32>
    %c0_52 = arith.constant 0 : index
    %c0_53 = arith.constant 0 : index
    %81 = vector.load %arg3[%c0_52, %c0_53] : memref<1x32xf32, #tpu.memory_space<vmem>>, vector<1x32xf32>
    %82 = vector.broadcast %81 : vector<1x32xf32> to vector<43x32xf32>
    %83 = arith.addf %80, %82 : vector<43x32xf32>
    %cst_54 = arith.constant 0.000000e+00 : f32
    %84 = vector.broadcast %cst_54 : f32 to vector<43x32xf32>
    %85 = arith.maximumf %83, %84 : vector<43x32xf32>
    %86 = vector.extract_strided_slice %1 {offsets = [0, 192], sizes = [43, 64], strides = [1, 1]} : vector<56x256xf32> to vector<43x64xf32>
    %c0_55 = arith.constant 0 : index
    %c0_56 = arith.constant 0 : index
    %c0_57 = arith.constant 0 : index
    %87 = vector.load %arg2[%c0_55, %c0_56, %c0_57] : memref<4x64x32xbf16, #tpu.memory_space<vmem>>, vector<1x64x32xbf16>
    %88 = vector.shape_cast %87 : vector<1x64x32xbf16> to vector<64x32xbf16>
    %89 = arith.truncf %86 : vector<43x64xf32> to vector<43x64xbf16>
    %cst_58 = arith.constant dense<0.000000e+00> : vector<43x32xf32>
    %90 = tpu.matmul %89, %88, %cst_58 {dimension_numbers = #tpu.dot_dimension_numbers<[1], [0], [0], [1], [0, 0, 1, 1], [], []>} : vector<43x64xbf16>, vector<64x32xbf16>, vector<43x32xf32> -> vector<43x32xf32>
    %91 = vector.extract_strided_slice %1 {offsets = [1, 128], sizes = [43, 64], strides = [1, 1]} : vector<56x256xf32> to vector<43x64xf32>
    %c1_59 = arith.constant 1 : index
    %c0_60 = arith.constant 0 : index
    %c0_61 = arith.constant 0 : index
    %92 = vector.load %arg2[%c1_59, %c0_60, %c0_61] : memref<4x64x32xbf16, #tpu.memory_space<vmem>>, vector<1x64x32xbf16>
    %93 = vector.shape_cast %92 : vector<1x64x32xbf16> to vector<64x32xbf16>
    %94 = arith.truncf %91 : vector<43x64xf32> to vector<43x64xbf16>
    %cst_62 = arith.constant dense<0.000000e+00> : vector<43x32xf32>
    %95 = tpu.matmul %94, %93, %cst_62 {dimension_numbers = #tpu.dot_dimension_numbers<[1], [0], [0], [1], [0, 0, 1, 1], [], []>} : vector<43x64xbf16>, vector<64x32xbf16>, vector<43x32xf32> -> vector<43x32xf32>
    %96 = arith.addf %90, %95 : vector<43x32xf32>
    %97 = vector.extract_strided_slice %1 {offsets = [5, 64], sizes = [43, 64], strides = [1, 1]} : vector<56x256xf32> to vector<43x64xf32>
    %c2_63 = arith.constant 2 : index
    %c0_64 = arith.constant 0 : index
    %c0_65 = arith.constant 0 : index
    %98 = vector.load %arg2[%c2_63, %c0_64, %c0_65] : memref<4x64x32xbf16, #tpu.memory_space<vmem>>, vector<1x64x32xbf16>
    %99 = vector.shape_cast %98 : vector<1x64x32xbf16> to vector<64x32xbf16>
    %100 = arith.truncf %97 : vector<43x64xf32> to vector<43x64xbf16>
    %cst_66 = arith.constant dense<0.000000e+00> : vector<43x32xf32>
    %101 = tpu.matmul %100, %99, %cst_66 {dimension_numbers = #tpu.dot_dimension_numbers<[1], [0], [0], [1], [0, 0, 1, 1], [], []>} : vector<43x64xbf16>, vector<64x32xbf16>, vector<43x32xf32> -> vector<43x32xf32>
    %102 = arith.addf %96, %101 : vector<43x32xf32>
    %103 = vector.extract_strided_slice %1 {offsets = [6, 0], sizes = [43, 64], strides = [1, 1]} : vector<56x256xf32> to vector<43x64xf32>
    %c3_67 = arith.constant 3 : index
    %c0_68 = arith.constant 0 : index
    %c0_69 = arith.constant 0 : index
    %104 = vector.load %arg2[%c3_67, %c0_68, %c0_69] : memref<4x64x32xbf16, #tpu.memory_space<vmem>>, vector<1x64x32xbf16>
    %105 = vector.shape_cast %104 : vector<1x64x32xbf16> to vector<64x32xbf16>
    %106 = arith.truncf %103 : vector<43x64xf32> to vector<43x64xbf16>
    %cst_70 = arith.constant dense<0.000000e+00> : vector<43x32xf32>
    %107 = tpu.matmul %106, %105, %cst_70 {dimension_numbers = #tpu.dot_dimension_numbers<[1], [0], [0], [1], [0, 0, 1, 1], [], []>} : vector<43x64xbf16>, vector<64x32xbf16>, vector<43x32xf32> -> vector<43x32xf32>
    %108 = arith.addf %102, %107 : vector<43x32xf32>
    %c0_71 = arith.constant 0 : index
    %c0_72 = arith.constant 0 : index
    %109 = vector.load %arg3[%c0_71, %c0_72] : memref<1x32xf32, #tpu.memory_space<vmem>>, vector<1x32xf32>
    %110 = vector.broadcast %109 : vector<1x32xf32> to vector<43x32xf32>
    %111 = arith.addf %108, %110 : vector<43x32xf32>
    %cst_73 = arith.constant 0.000000e+00 : f32
    %112 = vector.broadcast %cst_73 : f32 to vector<43x32xf32>
    %113 = arith.maximumf %111, %112 : vector<43x32xf32>
    %114 = tpu.concatenate %29, %57, %85, %113 in 1 : vector<43x32xf32>, vector<43x32xf32>, vector<43x32xf32>, vector<43x32xf32> -> vector<43x128xf32>
    %115 = vector.extract_strided_slice %114 {offsets = [0, 0], sizes = [37, 128], strides = [1, 1]} : vector<43x128xf32> to vector<37x128xf32>
    %c0_74 = arith.constant 0 : index
    %c0_75 = arith.constant 0 : index
    %c0_76 = arith.constant 0 : index
    %116 = vector.load %arg4[%c0_74, %c0_75, %c0_76] : memref<4x128x64xbf16, #tpu.memory_space<vmem>>, vector<1x128x64xbf16>
    %117 = vector.shape_cast %116 : vector<1x128x64xbf16> to vector<128x64xbf16>
    %118 = arith.truncf %115 : vector<37x128xf32> to vector<37x128xbf16>
    %cst_77 = arith.constant dense<0.000000e+00> : vector<37x64xf32>
    %119 = tpu.matmul %118, %117, %cst_77 {dimension_numbers = #tpu.dot_dimension_numbers<[1], [0], [0], [1], [0, 0, 1, 1], [], []>} : vector<37x128xbf16>, vector<128x64xbf16>, vector<37x64xf32> -> vector<37x64xf32>
    %120 = vector.extract_strided_slice %114 {offsets = [1, 0], sizes = [37, 128], strides = [1, 1]} : vector<43x128xf32> to vector<37x128xf32>
    %c1_78 = arith.constant 1 : index
    %c0_79 = arith.constant 0 : index
    %c0_80 = arith.constant 0 : index
    %121 = vector.load %arg4[%c1_78, %c0_79, %c0_80] : memref<4x128x64xbf16, #tpu.memory_space<vmem>>, vector<1x128x64xbf16>
    %122 = vector.shape_cast %121 : vector<1x128x64xbf16> to vector<128x64xbf16>
    %123 = arith.truncf %120 : vector<37x128xf32> to vector<37x128xbf16>
    %cst_81 = arith.constant dense<0.000000e+00> : vector<37x64xf32>
    %124 = tpu.matmul %123, %122, %cst_81 {dimension_numbers = #tpu.dot_dimension_numbers<[1], [0], [0], [1], [0, 0, 1, 1], [], []>} : vector<37x128xbf16>, vector<128x64xbf16>, vector<37x64xf32> -> vector<37x64xf32>
    %125 = arith.addf %119, %124 : vector<37x64xf32>
    %126 = vector.extract_strided_slice %114 {offsets = [5, 0], sizes = [37, 128], strides = [1, 1]} : vector<43x128xf32> to vector<37x128xf32>
    %c2_82 = arith.constant 2 : index
    %c0_83 = arith.constant 0 : index
    %c0_84 = arith.constant 0 : index
    %127 = vector.load %arg4[%c2_82, %c0_83, %c0_84] : memref<4x128x64xbf16, #tpu.memory_space<vmem>>, vector<1x128x64xbf16>
    %128 = vector.shape_cast %127 : vector<1x128x64xbf16> to vector<128x64xbf16>
    %129 = arith.truncf %126 : vector<37x128xf32> to vector<37x128xbf16>
    %cst_85 = arith.constant dense<0.000000e+00> : vector<37x64xf32>
    %130 = tpu.matmul %129, %128, %cst_85 {dimension_numbers = #tpu.dot_dimension_numbers<[1], [0], [0], [1], [0, 0, 1, 1], [], []>} : vector<37x128xbf16>, vector<128x64xbf16>, vector<37x64xf32> -> vector<37x64xf32>
    %131 = arith.addf %125, %130 : vector<37x64xf32>
    %132 = vector.extract_strided_slice %114 {offsets = [6, 0], sizes = [37, 128], strides = [1, 1]} : vector<43x128xf32> to vector<37x128xf32>
    %c3_86 = arith.constant 3 : index
    %c0_87 = arith.constant 0 : index
    %c0_88 = arith.constant 0 : index
    %133 = vector.load %arg4[%c3_86, %c0_87, %c0_88] : memref<4x128x64xbf16, #tpu.memory_space<vmem>>, vector<1x128x64xbf16>
    %134 = vector.shape_cast %133 : vector<1x128x64xbf16> to vector<128x64xbf16>
    %135 = arith.truncf %132 : vector<37x128xf32> to vector<37x128xbf16>
    %cst_89 = arith.constant dense<0.000000e+00> : vector<37x64xf32>
    %136 = tpu.matmul %135, %134, %cst_89 {dimension_numbers = #tpu.dot_dimension_numbers<[1], [0], [0], [1], [0, 0, 1, 1], [], []>} : vector<37x128xbf16>, vector<128x64xbf16>, vector<37x64xf32> -> vector<37x64xf32>
    %137 = arith.addf %131, %136 : vector<37x64xf32>
    %c0_90 = arith.constant 0 : index
    %c0_91 = arith.constant 0 : index
    %138 = vector.load %arg5[%c0_90, %c0_91] : memref<1x64xf32, #tpu.memory_space<vmem>>, vector<1x64xf32>
    %139 = vector.broadcast %138 : vector<1x64xf32> to vector<37x64xf32>
    %140 = arith.addf %137, %139 : vector<37x64xf32>
    %cst_92 = arith.constant 0.000000e+00 : f32
    %141 = vector.broadcast %cst_92 : f32 to vector<37x64xf32>
    %142 = arith.maximumf %140, %141 : vector<37x64xf32>
    %143 = vector.extract_strided_slice %142 {offsets = [0, 0], sizes = [25, 64], strides = [1, 1]} : vector<37x64xf32> to vector<25x64xf32>
    %c0_93 = arith.constant 0 : index
    %c0_94 = arith.constant 0 : index
    %c0_95 = arith.constant 0 : index
    %144 = vector.load %arg6[%c0_93, %c0_94, %c0_95] : memref<9x64x64xbf16, #tpu.memory_space<vmem>>, vector<1x64x64xbf16>
    %145 = vector.shape_cast %144 : vector<1x64x64xbf16> to vector<64x64xbf16>
    %146 = arith.truncf %143 : vector<25x64xf32> to vector<25x64xbf16>
    %cst_96 = arith.constant dense<0.000000e+00> : vector<25x64xf32>
    %147 = tpu.matmul %146, %145, %cst_96 {dimension_numbers = #tpu.dot_dimension_numbers<[1], [0], [0], [1], [0, 0, 1, 1], [], []>} : vector<25x64xbf16>, vector<64x64xbf16>, vector<25x64xf32> -> vector<25x64xf32>
    %148 = vector.extract_strided_slice %142 {offsets = [1, 0], sizes = [25, 64], strides = [1, 1]} : vector<37x64xf32> to vector<25x64xf32>
    %c1_97 = arith.constant 1 : index
    %c0_98 = arith.constant 0 : index
    %c0_99 = arith.constant 0 : index
    %149 = vector.load %arg6[%c1_97, %c0_98, %c0_99] : memref<9x64x64xbf16, #tpu.memory_space<vmem>>, vector<1x64x64xbf16>
    %150 = vector.shape_cast %149 : vector<1x64x64xbf16> to vector<64x64xbf16>
    %151 = arith.truncf %148 : vector<25x64xf32> to vector<25x64xbf16>
    %cst_100 = arith.constant dense<0.000000e+00> : vector<25x64xf32>
    %152 = tpu.matmul %151, %150, %cst_100 {dimension_numbers = #tpu.dot_dimension_numbers<[1], [0], [0], [1], [0, 0, 1, 1], [], []>} : vector<25x64xbf16>, vector<64x64xbf16>, vector<25x64xf32> -> vector<25x64xf32>
    %153 = arith.addf %147, %152 : vector<25x64xf32>
    %154 = vector.extract_strided_slice %142 {offsets = [2, 0], sizes = [25, 64], strides = [1, 1]} : vector<37x64xf32> to vector<25x64xf32>
    %c2_101 = arith.constant 2 : index
    %c0_102 = arith.constant 0 : index
    %c0_103 = arith.constant 0 : index
    %155 = vector.load %arg6[%c2_101, %c0_102, %c0_103] : memref<9x64x64xbf16, #tpu.memory_space<vmem>>, vector<1x64x64xbf16>
    %156 = vector.shape_cast %155 : vector<1x64x64xbf16> to vector<64x64xbf16>
    %157 = arith.truncf %154 : vector<25x64xf32> to vector<25x64xbf16>
    %cst_104 = arith.constant dense<0.000000e+00> : vector<25x64xf32>
    %158 = tpu.matmul %157, %156, %cst_104 {dimension_numbers = #tpu.dot_dimension_numbers<[1], [0], [0], [1], [0, 0, 1, 1], [], []>} : vector<25x64xbf16>, vector<64x64xbf16>, vector<25x64xf32> -> vector<25x64xf32>
    %159 = arith.addf %153, %158 : vector<25x64xf32>
    %160 = vector.extract_strided_slice %142 {offsets = [5, 0], sizes = [25, 64], strides = [1, 1]} : vector<37x64xf32> to vector<25x64xf32>
    %c3_105 = arith.constant 3 : index
    %c0_106 = arith.constant 0 : index
    %c0_107 = arith.constant 0 : index
    %161 = vector.load %arg6[%c3_105, %c0_106, %c0_107] : memref<9x64x64xbf16, #tpu.memory_space<vmem>>, vector<1x64x64xbf16>
    %162 = vector.shape_cast %161 : vector<1x64x64xbf16> to vector<64x64xbf16>
    %163 = arith.truncf %160 : vector<25x64xf32> to vector<25x64xbf16>
    %cst_108 = arith.constant dense<0.000000e+00> : vector<25x64xf32>
    %164 = tpu.matmul %163, %162, %cst_108 {dimension_numbers = #tpu.dot_dimension_numbers<[1], [0], [0], [1], [0, 0, 1, 1], [], []>} : vector<25x64xbf16>, vector<64x64xbf16>, vector<25x64xf32> -> vector<25x64xf32>
    %165 = arith.addf %159, %164 : vector<25x64xf32>
    %166 = vector.extract_strided_slice %142 {offsets = [6, 0], sizes = [25, 64], strides = [1, 1]} : vector<37x64xf32> to vector<25x64xf32>
    %c4 = arith.constant 4 : index
    %c0_109 = arith.constant 0 : index
    %c0_110 = arith.constant 0 : index
    %167 = vector.load %arg6[%c4, %c0_109, %c0_110] : memref<9x64x64xbf16, #tpu.memory_space<vmem>>, vector<1x64x64xbf16>
    %168 = vector.shape_cast %167 : vector<1x64x64xbf16> to vector<64x64xbf16>
    %169 = arith.truncf %166 : vector<25x64xf32> to vector<25x64xbf16>
    %cst_111 = arith.constant dense<0.000000e+00> : vector<25x64xf32>
    %170 = tpu.matmul %169, %168, %cst_111 {dimension_numbers = #tpu.dot_dimension_numbers<[1], [0], [0], [1], [0, 0, 1, 1], [], []>} : vector<25x64xbf16>, vector<64x64xbf16>, vector<25x64xf32> -> vector<25x64xf32>
    %171 = arith.addf %165, %170 : vector<25x64xf32>
    %172 = vector.extract_strided_slice %142 {offsets = [7, 0], sizes = [25, 64], strides = [1, 1]} : vector<37x64xf32> to vector<25x64xf32>
    %c5 = arith.constant 5 : index
    %c0_112 = arith.constant 0 : index
    %c0_113 = arith.constant 0 : index
    %173 = vector.load %arg6[%c5, %c0_112, %c0_113] : memref<9x64x64xbf16, #tpu.memory_space<vmem>>, vector<1x64x64xbf16>
    %174 = vector.shape_cast %173 : vector<1x64x64xbf16> to vector<64x64xbf16>
    %175 = arith.truncf %172 : vector<25x64xf32> to vector<25x64xbf16>
    %cst_114 = arith.constant dense<0.000000e+00> : vector<25x64xf32>
    %176 = tpu.matmul %175, %174, %cst_114 {dimension_numbers = #tpu.dot_dimension_numbers<[1], [0], [0], [1], [0, 0, 1, 1], [], []>} : vector<25x64xbf16>, vector<64x64xbf16>, vector<25x64xf32> -> vector<25x64xf32>
    %177 = arith.addf %171, %176 : vector<25x64xf32>
    %178 = vector.extract_strided_slice %142 {offsets = [10, 0], sizes = [25, 64], strides = [1, 1]} : vector<37x64xf32> to vector<25x64xf32>
    %c6 = arith.constant 6 : index
    %c0_115 = arith.constant 0 : index
    %c0_116 = arith.constant 0 : index
    %179 = vector.load %arg6[%c6, %c0_115, %c0_116] : memref<9x64x64xbf16, #tpu.memory_space<vmem>>, vector<1x64x64xbf16>
    %180 = vector.shape_cast %179 : vector<1x64x64xbf16> to vector<64x64xbf16>
    %181 = arith.truncf %178 : vector<25x64xf32> to vector<25x64xbf16>
    %cst_117 = arith.constant dense<0.000000e+00> : vector<25x64xf32>
    %182 = tpu.matmul %181, %180, %cst_117 {dimension_numbers = #tpu.dot_dimension_numbers<[1], [0], [0], [1], [0, 0, 1, 1], [], []>} : vector<25x64xbf16>, vector<64x64xbf16>, vector<25x64xf32> -> vector<25x64xf32>
    %183 = arith.addf %177, %182 : vector<25x64xf32>
    %184 = vector.extract_strided_slice %142 {offsets = [11, 0], sizes = [25, 64], strides = [1, 1]} : vector<37x64xf32> to vector<25x64xf32>
    %c7 = arith.constant 7 : index
    %c0_118 = arith.constant 0 : index
    %c0_119 = arith.constant 0 : index
    %185 = vector.load %arg6[%c7, %c0_118, %c0_119] : memref<9x64x64xbf16, #tpu.memory_space<vmem>>, vector<1x64x64xbf16>
    %186 = vector.shape_cast %185 : vector<1x64x64xbf16> to vector<64x64xbf16>
    %187 = arith.truncf %184 : vector<25x64xf32> to vector<25x64xbf16>
    %cst_120 = arith.constant dense<0.000000e+00> : vector<25x64xf32>
    %188 = tpu.matmul %187, %186, %cst_120 {dimension_numbers = #tpu.dot_dimension_numbers<[1], [0], [0], [1], [0, 0, 1, 1], [], []>} : vector<25x64xbf16>, vector<64x64xbf16>, vector<25x64xf32> -> vector<25x64xf32>
    %189 = arith.addf %183, %188 : vector<25x64xf32>
    %190 = vector.extract_strided_slice %142 {offsets = [12, 0], sizes = [25, 64], strides = [1, 1]} : vector<37x64xf32> to vector<25x64xf32>
    %c8 = arith.constant 8 : index
    %c0_121 = arith.constant 0 : index
    %c0_122 = arith.constant 0 : index
    %191 = vector.load %arg6[%c8, %c0_121, %c0_122] : memref<9x64x64xbf16, #tpu.memory_space<vmem>>, vector<1x64x64xbf16>
    %192 = vector.shape_cast %191 : vector<1x64x64xbf16> to vector<64x64xbf16>
    %193 = arith.truncf %190 : vector<25x64xf32> to vector<25x64xbf16>
    %cst_123 = arith.constant dense<0.000000e+00> : vector<25x64xf32>
    %194 = tpu.matmul %193, %192, %cst_123 {dimension_numbers = #tpu.dot_dimension_numbers<[1], [0], [0], [1], [0, 0, 1, 1], [], []>} : vector<25x64xbf16>, vector<64x64xbf16>, vector<25x64xf32> -> vector<25x64xf32>
    %195 = arith.addf %189, %194 : vector<25x64xf32>
    %c0_124 = arith.constant 0 : index
    %c0_125 = arith.constant 0 : index
    %196 = vector.load %arg7[%c0_124, %c0_125] : memref<1x64xf32, #tpu.memory_space<vmem>>, vector<1x64xf32>
    %197 = vector.broadcast %196 : vector<1x64xf32> to vector<25x64xf32>
    %198 = arith.addf %195, %197 : vector<25x64xf32>
    %cst_126 = arith.constant 0.000000e+00 : f32
    %199 = vector.broadcast %cst_126 : f32 to vector<25x64xf32>
    %200 = arith.maximumf %198, %199 : vector<25x64xf32>
    %201 = vector.extract_strided_slice %200 {offsets = [0, 0], sizes = [1, 64], strides = [1, 1]} : vector<25x64xf32> to vector<1x64xf32>
    %c0_127 = arith.constant 0 : index
    %c0_128 = arith.constant 0 : index
    %202 = vector.load %arg8[%c0_127, %c0_128] : memref<64x512xbf16, #tpu.memory_space<vmem>>, vector<64x512xbf16>
    %203 = arith.truncf %201 : vector<1x64xf32> to vector<1x64xbf16>
    %cst_129 = arith.constant dense<0.000000e+00> : vector<1x512xf32>
    %204 = tpu.matmul %203, %202, %cst_129 {dimension_numbers = #tpu.dot_dimension_numbers<[1], [0], [0], [1], [0, 0, 1, 1], [], []>} : vector<1x64xbf16>, vector<64x512xbf16>, vector<1x512xf32> -> vector<1x512xf32>
    %c0_130 = arith.constant 0 : index
    %c0_131 = arith.constant 0 : index
    %205 = vector.load %arg9[%c0_130, %c0_131] : memref<1x512xf32, #tpu.memory_space<vmem>>, vector<1x512xf32>
    %206 = arith.addf %204, %205 : vector<1x512xf32>
    %cst_132 = arith.constant 0.000000e+00 : f32
    %207 = vector.broadcast %cst_132 : f32 to vector<1x512xf32>
    %208 = arith.maximumf %206, %207 : vector<1x512xf32>
    %c0_133 = arith.constant 0 : index
    %c0_134 = arith.constant 0 : index
    %209 = vector.load %arg10[%c0_133, %c0_134] : memref<512x128xbf16, #tpu.memory_space<vmem>>, vector<512x128xbf16>
    %210 = arith.truncf %208 : vector<1x512xf32> to vector<1x512xbf16>
    %cst_135 = arith.constant dense<0.000000e+00> : vector<1x128xf32>
    %211 = tpu.matmul %210, %209, %cst_135 {dimension_numbers = #tpu.dot_dimension_numbers<[1], [0], [0], [1], [0, 0, 1, 1], [], []>} : vector<1x512xbf16>, vector<512x128xbf16>, vector<1x128xf32> -> vector<1x128xf32>
    %c0_136 = arith.constant 0 : index
    %c0_137 = arith.constant 0 : index
    %212 = vector.load %arg11[%c0_136, %c0_137] : memref<1x128xf32, #tpu.memory_space<vmem>>, vector<1x128xf32>
    %213 = arith.addf %211, %212 : vector<1x128xf32>
    %c0_138 = arith.constant 0 : index
    %c0_139 = arith.constant 0 : index
    %c0_140 = arith.constant 0 : index
    %214 = vector.load %arg12[%c0_138, %c0_139, %c0_140] : memref<1x1x128xf32, #tpu.memory_space<vmem>>, vector<1x1x128xf32>
    %215 = vector.shape_cast %214 : vector<1x1x128xf32> to vector<1x128xf32>
    %216 = vector.shape_cast %213 : vector<1x128xf32> to vector<1x1x128xf32>
    tpu.vector_store %arg12[%c0_138, %c0_139, %c0_140], %216 {strides = array<i32>} : memref<1x1x128xf32, #tpu.memory_space<vmem>>, vector<1x1x128xf32>,
    return
  }
  func.func @transform_0(%arg0: i32) -> (i32, i32, i32) {
    %c0_i32 = arith.constant 0 : i32
    %c0_i32_0 = arith.constant 0 : i32
    %c0_i32_1 = arith.constant 0 : i32
    return %arg0, %c0_i32, %c0_i32_0 : i32, i32, i32
  }
  func.func @transform_1(%arg0: i32) -> (i32, i32, i32) {
    %c0_i32 = arith.constant 0 : i32
    %c0_i32_0 = arith.constant 0 : i32
    %c0_i32_1 = arith.constant 0 : i32
    %c0_i32_2 = arith.constant 0 : i32
    return %c0_i32, %c0_i32_0, %c0_i32_1 : i32, i32, i32
  }
  func.func @transform_2(%arg0: i32) -> (i32, i32) {
    %c0_i32 = arith.constant 0 : i32
    %c0_i32_0 = arith.constant 0 : i32
    %c0_i32_1 = arith.constant 0 : i32
    return %c0_i32, %c0_i32_0 : i32, i32
  }
  func.func @transform_3(%arg0: i32) -> (i32, i32, i32) {
    %c0_i32 = arith.constant 0 : i32
    %c0_i32_0 = arith.constant 0 : i32
    %c0_i32_1 = arith.constant 0 : i32
    %c0_i32_2 = arith.constant 0 : i32
    return %c0_i32, %c0_i32_0, %c0_i32_1 : i32, i32, i32
  }
  func.func @transform_4(%arg0: i32) -> (i32, i32) {
    %c0_i32 = arith.constant 0 : i32
    %c0_i32_0 = arith.constant 0 : i32
    %c0_i32_1 = arith.constant 0 : i32
    return %c0_i32, %c0_i32_0 : i32, i32
  }
  func.func @transform_5(%arg0: i32) -> (i32, i32, i32) {
    %c0_i32 = arith.constant 0 : i32
    %c0_i32_0 = arith.constant 0 : i32
    %c0_i32_1 = arith.constant 0 : i32
    %c0_i32_2 = arith.constant 0 : i32
    return %c0_i32, %c0_i32_0, %c0_i32_1 : i32, i32, i32
  }
  func.func @transform_6(%arg0: i32) -> (i32, i32) {
    %c0_i32 = arith.constant 0 : i32
    %c0_i32_0 = arith.constant 0 : i32
    %c0_i32_1 = arith.constant 0 : i32
    return %c0_i32, %c0_i32_0 : i32, i32
  }
  func.func @transform_7(%arg0: i32) -> (i32, i32) {
    %c0_i32 = arith.constant 0 : i32
    %c0_i32_0 = arith.constant 0 : i32
    %c0_i32_1 = arith.constant 0 : i32
    return %c0_i32, %c0_i32_0 : i32, i32
  }
  func.func @transform_8(%arg0: i32) -> (i32, i32) {
    %c0_i32 = arith.constant 0 : i32
    %c0_i32_0 = arith.constant 0 : i32
    %c0_i32_1 = arith.constant 0 : i32
    return %c0_i32, %c0_i32_0 : i32, i32
  }
  func.func @transform_9(%arg0: i32) -> (i32, i32) {
    %c0_i32 = arith.constant 0 : i32
    %c0_i32_0 = arith.constant 0 : i32
    %c0_i32_1 = arith.constant 0 : i32
    return %c0_i32, %c0_i32_0 : i32, i32
  }
  func.func @transform_10(%arg0: i32) -> (i32, i32) {
    %c0_i32 = arith.constant 0 : i32
    %c0_i32_0 = arith.constant 0 : i32
    %c0_i32_1 = arith.constant 0 : i32
    return %c0_i32, %c0_i32_0 : i32, i32
  }
  func.func @transform_11(%arg0: i32) -> (i32, i32, i32) {
    %c0_i32 = arith.constant 0 : i32
    %c0_i32_0 = arith.constant 0 : i32
    %c0_i32_1 = arith.constant 0 : i32
    return %arg0, %c0_i32, %c0_i32_0 : i32, i32, i32
  }
}

</mosaic_0001>

<bundles_post_ra>
// kernel: mul.6
= control target key start
LH: loop header
LB: loop body
LE: loop exit
PB: predicated region body
PF: predicated region fallthrough
CT: control target
= control target key end

     0   :  { %s100_s0 = inlined_call_operand.vmem [shape: f32[4,512], index: 0, kind: input, shape index: {}]   ;;  %s101_s1 = inlined_call_operand.vmem [shape: f32[4,512], index: 1, kind: input, shape index: {}]   ;;  %s102_s2 = inlined_call_operand.vmem [shape: f32[4,512], index: 2, kind: output, shape index: {}]  }
   0x1   :  { %v3_v0 = vld [vmem:[%s100_s0] sm:$0xf]  ;;  %v40_v2 = vld [vmem:[%s100_s0 + $0x4] sm:$0xf]  ;;  %v43_v5 = vld [vmem:[%s100_s0 + $0x8] sm:$0xf] }
   0x2   :  { %v4_v1 = vld [vmem:[%s101_s1] sm:$0xf]  ;;  %v41_v4 = vld [vmem:[%s101_s1 + $0x4] sm:$0xf]  ;;  %v44_v6 = vld [vmem:[%s101_s1 + $0x8] sm:$0xf] }
   0x3   :  { %v7_v3 = vmul.f32 %v4_v1, %v3_v0  ;;  %v16_v7 = vmul.f32 %v41_v4, %v40_v2  ;;  %v26_v8 = vmul.f32 %v44_v6, %v43_v5  ;;  %v46_v9 = vld [vmem:[%s100_s0 + $0xc] sm:$0xf] }
   0x4   :  { %v47_v10 = vld [vmem:[%s101_s1 + $0xc] sm:$0xf] }
   0x5   :  { %9 = vst [vmem:[%s102_s2] sm:$0xf] %v7_v3  ;;  %v36_v11 = vmul.f32 %v47_v10, %v46_v9 }
   0x6   :  { %42 = vst [vmem:[%s102_s2 + $0x4] sm:$0xf] %v16_v7 }
   0x7   :  { %45 = vst [vmem:[%s102_s2 + $0x8] sm:$0xf] %v26_v8 }
   0x8   :  { %48 = vst [vmem:[%s102_s2 + $0xc] sm:$0xf] %v36_v11 }

// kernel: dqn_forward.1
= control target key start
LH: loop header
LB: loop body
LE: loop exit
PB: predicated region body
PF: predicated region fallthrough
CT: control target
= control target key end

     0   :  { %s4955_s0 = inlined_call_operand.vmem [shape: f32[2,56,256], index: 0, kind: input, shape index: {}]   ;;  %s4956_s1 = inlined_call_operand.vmem [shape: bf16[4,64,32], index: 1, kind: input, shape index: {}]   ;;  %s4957_s2 = inlined_call_operand.vmem [shape: f32[1,32], index: 2, kind: input, shape index: {}]   ;;  %s4958_s3 = inlined_call_operand.vmem [shape: bf16[4,128,64], index: 3, kind: input, shape index: {}]   ;;  %s4959_s4 = inlined_call_operand.vmem [shape: f32[1,64], index: 4, kind: input, shape index: {}]   ;;  %s4960_s5 = inlined_call_operand.vmem [shape: bf16[9,64,64], index: 5, kind: input, shape index: {}]   ;;  %s4961_s6 = inlined_call_operand.vmem [shape: f32[1,64], index: 6, kind: input, shape index: {}]   ;;  %s4962_s7 = inlined_call_operand.vmem [shape: bf16[64,512], index: 7, kind: input, shape index: {}]   ;;  %s4963_s8 = inlined_call_operand.vmem [shape: f32[1,512], index: 8, kind: input, shape index: {}]   ;;  %s4964_s9 = inlined_call_operand.vmem [shape: bf16[512,128], index: 9, kind: input, shape index: {}]   ;;  %s4965_s10 = inlined_call_operand.vmem [shape: f32[1,128], index: 10, kind: input, shape index: {}]   ;;  %s4966_s11 = inlined_call_operand.hbm [shape: f32[2,1,128], index: 11, kind: output, shape index: {}]  }
   0x1   :  { %4967 = sst [smem:[#allocation5_spill]] %s4955_s0 }
   0x2   :  { %16 = vsyncpa [#allocation3], 0 }
   0x3   :  { %18 = vsyncpa [#allocation3 + $0x1], 0  ;;  %s3929_s17 = smov 0   ;;  %s3931_s18 = smov 0  }
   0x4   :  { %s3933_s19 = smov 0   ;;  %s3935_s20 = smov 0  }
   0x5 LB: > { %s3950_s21 = sadd.s32 4294967295, %s3864_s20   ;;  %s2838_s22 = sadd.s32 4294967294, %s3864_s20   ;;  %s3864_s20 = sphi %s3935_s20, %s4974_s20   ;;  %s3860_s19 = sphi %s3933_s19, %s4973_s19   ;;  %s3856_s18 = sphi %s3931_s18, %s4972_s18   ;;  %s3852_s17 = sphi %s3929_s17, %s4971_s17  }
   0x6   : > { %s3954_s23 = sadd.s32 1, %s3864_s20   ;;  %s267_s24 = sadd.s32 1, %s3860_s19 }
   0x7   : > { %s264_s25 = ssub.s32 %s3864_s20, %s3954_s23  ;;  %p277_p0 = scmp.ne.s32.totalorder %s3860_s19, %s3856_s18 }
   0x8   : > { %p265_p1 = scmp.eq.s32.totalorder %s264_s25, 0  ;;  %p278_p2 = scmp.eq.s32.totalorder %s3950_s21, 1 }
   0x9   : > { %p283_p3 = scmp.ne.s32.totalorder %s3856_s18, %s3852_s17  ;;  %p284_p4 = scmp.eq.s32.totalorder %s2838_s22, 1 }
   0xa   : > { %s3965_s26 = scalar_select %p265_p1, %s3860_s19, %s267_s24  }
   0xb   : > { %p3967_p5 = por %p278_p2, %p277_p0  ;;  %p3971_p6 = por %p284_p4, %p283_p3 }
   0xc   : > { %p2841_p7 = scmp.ge.s32.totalorder %s3864_s20, 1  ;;  %p340_p8 = scmp.lt.s32.totalorder %s3864_s20, 3 }
   0xe   : > { %p341_p9 = pnand %p2841_p7, %p340_p8 }
   0xf   : > { %p379_p10 = scmp.lt.s32.totalorder (!%p341_p9), %s3950_s21, 1  ;;  %s4970_s0 = sld [smem:[#allocation5_spill]] (!%p341_p9) }
  0x10   : > { %344 = sbr.rel (%p341_p9) target bundleno = 1220 (0x4c4), region = 64  ;;  %s3866_s22 = smov (!%p341_p9), 64  }
  0x11   : > { %s3867_s15 = smov (!%p341_p9), 32  }
  0x15   : > { %v3981_v0 = vld [vmem:[%s4956_s1 + $0x58] sm:$0xff]  ;;  %s380_s14 = scalar_select %p379_p10, %s3950_s21, 1  ;;  %v3993_v2 = vld [vmem:[%s4956_s1 + $0x50] sm:$0xff]  ;;  %v4010_v4 = vld [vmem:[%s4956_s1 + $0x48] sm:$0xff]  ;;  %vm451_vm0 = vcmask 523264   ;;  %vm1129_vm3 = vcmask 1044480  }
  0x16   : > { %v3986_v1 = vld [vmem:[%s4956_s1 + $0x18] sm:$0xff]  ;;  %591 = vmatpush.bf16.msra.mxu2 %v3981_v0  ;;  %v3999_v3 = vld [vmem:[%s4956_s1 + $0x10] sm:$0xff]  ;;  %v4016_v5 = vld [vmem:[%s4956_s1 + $0x8] sm:$0xff]  ;;  %vm941_vm1 = vsmask.f32 5376  ;;  %vm1260_vm4 = vcmask 261120  }
  0x17   : > { %522 = vmatpush.bf16.msra.mxu1 %v3986_v1  ;;  %s3711_s25 = smul.u32 112, %s380_s14  ;;  %v4042_v20 = vld [vmem:[%s4956_s1 + $0x40] sm:$0xff]  ;;  %v4081_v34 = vld [vmem:[%s4956_s1 + $0x78] sm:$0xff]  ;;  %v4100_v40 = vld [vmem:[%s4956_s1 + $0x70] sm:$0xff]  ;;  %vm714_vm2 = vsmask.f32 7424 }
  0x18   : > { %v4052_v22 = vld [vmem:[%s4956_s1] sm:$0xff]  ;;  %v4090_v35 = vld [vmem:[%s4956_s1 + $0x38] sm:$0xff]  ;;  %672 = vmatpush.bf16.msra.mxu3 %v4081_v34  ;;  %v4107_v41 = vld [vmem:[%s4956_s1 + $0x30] sm:$0xff]  ;;  %s3868_s14 = smov 96   ;;  %vm1273_vm5 = vcmask 785408   ;;  %vm1850_vm6 = vcmask 1046528  }
  0x19   : > { %s4004_s12 = scalar_lea.vmem %s4970_s0, %s3711_s25  ;;  %465 = vmatpush.bf16.msra.mxu0 %v4090_v35  ;;  %v4125_v46 = vld [vmem:[%s4956_s1 + $0x68] sm:$0xff]  ;;  %v4140_v48 = vld [vmem:[%s4956_s1 + $0x60] sm:$0xff]  ;;  %vm2032_vm7 = vsmask.f32 4352  ;;  %vm2159_vm8 = vsmask.f32 6400 }
  0x1a   : > { %592 = vmatpush.bf16.msra.mxu2 %v3993_v2  ;;  %v386_v6 = vld [vmem:[%s4004_s12 + $0x8] sm:$0xff]  ;;  %v388_v7 = vld [vmem:[%s4004_s12 + $0x18] sm:$0xff]  ;;  %v385_v8 = vld [vmem:[%s4004_s12] sm:$0xff]  ;;  %vm2233_vm9 = vcmask 1045504  }
  0x1b   : > { %523 = vmatpush.bf16.msra.mxu1 %v3999_v3  ;;  %v4021_v9 = vpack.c.bf16 %v388_v7, %v386_v6  ;;  %v387_v10 = vld [vmem:[%s4004_s12 + $0x10] sm:$0xff]  ;;  %v390_v11 = vld [vmem:[%s4004_s12 + $0x28] sm:$0xff]  ;;  %v392_v12 = vld [vmem:[%s4004_s12 + $0x38] sm:$0xff] }
  0x1c   : > { %v4026_v13 = vpack.c.bf16 %v387_v10, %v385_v8  ;;  %v4028_v14 = vpack.c.bf16 %v392_v12, %v390_v11  ;;  %v389_v15 = vld [vmem:[%s4004_s12 + $0x20] sm:$0xff]  ;;  %v391_v16 = vld [vmem:[%s4004_s12 + $0x30] sm:$0xff]  ;;  %v394_v17 = vld [vmem:[%s4004_s12 + $0x48] sm:$0xff]  ;;  %673 = vmatpush.bf16.msra.mxu3 %v4100_v40 }
  0x1d   : > { %629 = vrot.lane.b32.xlu0 %v4021_v9, %s3866_s22  ;;  %v4035_v18 = vpack.c.bf16 %v391_v16, %v389_v15  ;;  %v396_v19 = vld [vmem:[%s4004_s12 + $0x58] sm:$0xff]  ;;  %v393_v27 = vld [vmem:[%s4004_s12 + $0x40] sm:$0xff]  ;;  %v395_v28 = vld [vmem:[%s4004_s12 + $0x50] sm:$0xff]  ;;  %466 = vmatpush.bf16.msra.mxu0 %v4107_v41  ;;  %v824_v56 = vshll.u32 %v4021_v9, 16  ;;  %v822_v58 = vshrl.u32 %v4021_v9, 16 }
  0x1e   : > { %593 = vmatpush.bf16.msra.mxu2 %v4010_v4  ;;  %631 = vrot.lane.b32.xlu1 %v4028_v14, %s3866_s22  ;;  %v4046_v21 = vpack.c.bf16 %v396_v19, %v394_v17  ;;  %v715_v23 = vshrl.u32 %v4026_v13, 16  ;;  %v717_v24 = vshll.u32 %v4026_v13, 16  ;;  %v4073_v33 = vpack.c.bf16 %v395_v28, %v393_v27  ;;  %v4172_v49 = vld [vmem:[%s4956_s1 + $0x28] sm:$0xff]  ;;  %v4178_v50 = vld [vmem:[%s4956_s1 + $0x20] sm:$0xff] }
  0x1f   : > { %524 = vmatpush.bf16.msra.mxu1 %v4016_v5  ;;  %v721_v25 = vshll.u32 %v4035_v18, 16  ;;  %v725_v26 = vshrl.u32 %v4035_v18, 16  ;;  %v826_v59 = vrot.slane %v824_v56, 1  ;;  %v828_v60 = vshll.u32 %v4028_v14, 16 }
  0x20   : > { %633 = vrot.lane.b32.xlu2 %v4046_v21, %s3866_s22  ;;  %v942_v29 = vrot.slane %v715_v23, 2  ;;  %v943_v30 = vrot.slane %v717_v24, 3  ;;  %v728_v36 = vshll.u32 %v4073_v33, 16  ;;  %v732_v37 = vshrl.u32 %v4073_v33, 16  ;;  %674 = vmatpush.bf16.msra.mxu3 %v4125_v46 }
  0x21   : > { %v945_v31 = vrot.slane %v725_v26, 2  ;;  %v946_v32 = vrot.slane %v721_v25, 3  ;;  %467 = vmatpush.bf16.msra.mxu0 %v4172_v49  ;;  %v827_v61 = vor.u32 %v826_v59, %v822_v58  ;;  %v830_v62 = vrot.slane %v828_v60, 1 }
  0x22   : > { %594 = vmatpush.bf16.msra.mxu2 %v4042_v20  ;;  %v944_v38 = vor.u32 %v943_v30, %v942_v29  ;;  %v949_v42 = vrot.slane %v732_v37, 2  ;;  %v950_v43 = vrot.slane %v728_v36, 3  ;;  %v730_v10 = vrot.slane %v728_v36, 1 }
  0x23   : > { %525 = vmatpush.bf16.msra.mxu1 %v4052_v22  ;;  %v947_v39 = vor.u32 %v946_v32, %v945_v31  ;;  %v4229_v63 = vsel %vm714_vm2, %v827_v61, %v830_v62  ;;  %v839_v12 = vshrl.u32 %v4046_v21, 16  ;;  %v1130_v36 = vrot.slane %v4026_v13, 3 }
  0x24   : > { %v4116_v44 = vor.u32 %v950_v43, %v949_v42  ;;  %675 = vmatpush.bf16.msra.mxu3 %v4140_v48  ;;  %v734_v16 = vor.u32 %v732_v37, %v730_v10  ;;  %v1131_v37 = vrot.slane %v4035_v18, 3 }
  0x25   : > { %2913 = vmatmul.msk.bf16.vlgmr.msra.gmra.mxu2 %vm451_vm0, %v4021_v9  ;;  %421 = vrot.lane.b32.xlu0 %v4026_v13, %s3866_s22  ;;  %v4119_v45 = vsel %vm941_vm1, %v944_v38, %v947_v39 }
  0x26   : > { %796 = vmatpush.bf16.msrb.mxu2 %v3981_v0  ;;  %2886 = vmatmul.msk.bf16.vlgmr.msra.gmra.mxu1 %vm451_vm0, %v4026_v13  ;;  %v4131_v47 = vsel %vm941_vm1, %v947_v39, %v4116_v44  ;;  %v1132_v42 = vsel %vm1129_vm3, %v1130_v36, %v1131_v37 }
  0x27   : > { %772 = vmatpush.bf16.msrb.mxu1 %v3986_v1  ;;  %423 = vrot.lane.b32.xlu1 %v4035_v18, %s3866_s22 }
  0x28   : > { %425 = vrot.lane.b32.xlu2 %v4073_v33, %s3866_s22  ;;  %855 = vmatpush.bf16.msrb.mxu3 %v4081_v34 }
  0x29   : > { %468 = vmatpush.bf16.msra.mxu0 %v4178_v50 }
  0x2a   : > { %797 = vmatpush.bf16.msrb.mxu2 %v3993_v2 }
  0x2b   : > { %773 = vmatpush.bf16.msrb.mxu1 %v3999_v3 }
  0x2c   : > { %856 = vmatpush.bf16.msrb.mxu3 %v4100_v40 }
  0x2d   : > { %992 = vrot.lane.b32.xlu0 %v4119_v45, %s3866_s22  ;;  %748 = vmatpush.bf16.msrb.mxu0 %v4090_v35 }
  0x2e   : > { %798 = vmatpush.bf16.msrb.mxu2 %v4010_v4 }
  0x2f   : > { %774 = vmatpush.bf16.msrb.mxu1 %v4016_v5  ;;  %994 = vrot.lane.b32.xlu1 %v4131_v47, %s3866_s22 }
  0x30   : > { %996 = vrot.lane.b32.xlu2 %v4116_v44, %s3866_s22  ;;  %857 = vmatpush.bf16.msrb.mxu3 %v4125_v46 }
  0x31   : > { %749 = vmatpush.bf16.msrb.mxu0 %v4107_v41 }
  0x32   : > { %799 = vmatpush.bf16.msrb.mxu2 %v4042_v20 }
  0x33   : > { %775 = vmatpush.bf16.msrb.mxu1 %v4052_v22 }
  0x34   : > { %858 = vmatpush.bf16.msrb.mxu3 %v4140_v48 }
  0x35   : > { %2914 = vmatmul.msk.bf16.gmra.mxu2 %vm451_vm0, %v4028_v14  ;;  %750 = vmatpush.bf16.msrb.mxu0 %v4172_v49 }
  0x36   : > { %966 = vmatpush.bf16.msra.mxu2 %v3981_v0  ;;  %2887 = vmatmul.msk.bf16.gmra.mxu1 %vm451_vm0, %v4035_v18 }
  0x37   : > { %921 = vmatpush.bf16.msra.mxu1 %v3986_v1 }
  0x39   : > { %751 = vmatpush.bf16.msrb.mxu0 %v4178_v50 }
  0x3a   : > { %967 = vmatpush.bf16.msra.mxu2 %v3993_v2 }
  0x3b   : > { %922 = vmatpush.bf16.msra.mxu1 %v3999_v3 }
  0x3e   : > { %968 = vmatpush.bf16.msra.mxu2 %v4010_v4 }
  0x3f   : > { %923 = vmatpush.bf16.msra.mxu1 %v4016_v5 }
  0x42   : > { %969 = vmatpush.bf16.msra.mxu2 %v4042_v20 }
  0x43   : > { %924 = vmatpush.bf16.msra.mxu1 %v4052_v22 }
  0x45   : > { %2915 = vmatmul.msk.bf16.gmra.mxu2 %vm451_vm0, %v4046_v21 }
  0x46   : > { %2888 = vmatmul.msk.bf16.gmra.mxu1 %vm451_vm0, %v4073_v33 }
  0x7a   : > { %v4217_v55 = vpop.permute.xlu2 %633 }
  0x82   : > { %v426_v57 = vpop.permute.xlu2 %425 }
  0x8a   : > { %v997_v27 = vpop.permute.xlu2 %996 }
  0x8f   : > { %v4185_v51 = vpop.permute.xlu0 %629 }
  0x90   : > { %2940 = vmatmul.msk.bf16.vlgmr.msra.gmra.mxu3 %vm451_vm0, %v4185_v51  ;;  %2949 = vmatmul.msk.bf16.vlgmr.msrb.gmra.mxu2 %vm451_vm0, %v4185_v51  ;;  %v4201_v53 = vpop.permute.xlu1 %631 }
  0x91   : > { %1011 = vmatpush.bf16.msra.mxu3 %v4081_v34  ;;  %1101 = vmatpush.bf16.msrb.mxu2 %v3981_v0  ;;  %v719_v0 = vrot.slane %v717_v24, 1 }
  0x95   : > { %1012 = vmatpush.bf16.msra.mxu3 %v4100_v40  ;;  %1102 = vmatpush.bf16.msrb.mxu2 %v3993_v2  ;;  %v723_v2 = vrot.slane %v721_v25, 1 }
  0x97   : > { %v422_v52 = vpop.permute.xlu0 %421 }
  0x98   : > { %2867 = vmatmul.msk.bf16.vlgmr.msra.gmra.mxu0 %vm451_vm0, %v422_v52  ;;  %2946 = vmatmul.msk.bf16.vlgmr.msrb.gmra.mxu1 %vm451_vm0, %v422_v52 }
  0x99   : > { %897 = vmatpush.bf16.msra.mxu0 %v4090_v35  ;;  %1013 = vmatpush.bf16.msra.mxu3 %v4125_v46  ;;  %v424_v54 = vpop.permute.xlu1 %423 }
  0x9a   : > { %1077 = vmatpush.bf16.msrb.mxu1 %v3986_v1  ;;  %1103 = vmatpush.bf16.msrb.mxu2 %v4010_v4  ;;  %v720_v1 = vor.u32 %v719_v0, %v715_v23  ;;  %v832_v4 = vshrl.u32 %v4028_v14, 16 }
  0x9c   : > { %v834_v6 = vor.u32 %v832_v4, %v830_v62 }
  0x9d   : > { %898 = vmatpush.bf16.msra.mxu0 %v4107_v41  ;;  %1014 = vmatpush.bf16.msra.mxu3 %v4140_v48 }
  0x9e   : > { %1078 = vmatpush.bf16.msrb.mxu1 %v3999_v3  ;;  %1104 = vmatpush.bf16.msrb.mxu2 %v4042_v20  ;;  %v724_v3 = vsel %vm714_vm2, %v720_v1, %v723_v2 }
  0xa0   : > { %2941 = vmatmul.msk.bf16.gmra.mxu3 %vm451_vm0, %v4201_v53  ;;  %2950 = vmatmul.msk.bf16.gmra.mxu2 %vm451_vm0, %v4201_v53 }
  0xa1   : > { %899 = vmatpush.bf16.msra.mxu0 %v4172_v49  ;;  %v995_v25 = vpop.permute.xlu1 %994 }
  0xa2   : > { %1079 = vmatpush.bf16.msrb.mxu1 %v4016_v5  ;;  %v835_v5 = vshll.u32 %v4046_v21, 16 }
  0xa3   : > { %v527_v17 = vpop.f32.mrf.mxu1 }
  0xa4   : > { %v837_v7 = vrot.slane %v835_v5, 1 }
  0xa5   : > { %900 = vmatpush.bf16.msra.mxu0 %v4178_v50 }
  0xa6   : > { %1080 = vmatpush.bf16.msrb.mxu1 %v4052_v22  ;;  %v4252_v8 = vsel %vm714_vm2, %v834_v6, %v837_v7  ;;  %v4271_v15 = vor.u32 %v839_v12, %v837_v7 }
  0xa8   : > { %2868 = vmatmul.msk.bf16.gmra.mxu0 %vm451_vm0, %v424_v54  ;;  %2947 = vmatmul.msk.bf16.gmra.mxu1 %vm451_vm0, %v424_v54  ;;  %v596_v19 = vpop.f32.mrf.mxu2  ;;  %v397_v54 = vld [vmem:[%s4004_s12 + $0x60] sm:$0xff]  ;;  %s2779_s12 = scalar_lea.hbm %s4966_s11, %s3950_s21 }
  0xa9   : > { %s2783_s16 = sshll.u32 %s2779_s12, 4  ;;  %s2784_s16 = int_to_ptr.hbm [resolvable:$true] %s2783_s16 }
  0xaa   : > { %s3816_s0 = sshra.s32 %s2784_s16, 4  ;;  %s3817_s0 = int_to_ptr.hbm [resolvable:$true] %s3816_s0 }
  0xab   : > { %v4284_v20 = vpop.f32.mrf.mxu1  ;;  %s3818_s25 = scalar_lea.hbm %s3817_s0, 1  ;;  %p3823_p0 = scmp.lt.s32.totalorder %s3817_s0, %s4966_s11 }
  0xac   : > { %p3819_p11 = scmp.ne.s32.totalorder %s3817_s0, %s3818_s25 }
  0xae   : > { %p3820_p12 = pnand %p3819_p11, %p3967_p5 }
  0xb0   : > { %2942 = vmatmul.msk.bf16.gmra.mxu3 %vm451_vm0, %v4217_v55  ;;  %2951 = vmatmul.msk.bf16.gmra.mxu2 %vm451_vm0, %v4217_v55  ;;  %v4286_v22 = vpop.f32.mrf.mxu2  ;;  %p3821_p13 = pneg %p3820_p12 }
  0xb3   : > { %v532_v23 = vpop.f32.mrf.mxu1 }
  0xb8   : > { %2869 = vmatmul.msk.bf16.gmra.mxu0 %vm451_vm0, %v426_v57  ;;  %2948 = vmatmul.msk.bf16.gmra.mxu1 %vm451_vm0, %v426_v57  ;;  %v601_v24 = vpop.f32.mrf.mxu2  ;;  %v1127_v57 = vpack.c.bf16 %v397_v54, %v397_v54 }
  0xba   : > { %v1135_v61 = vrot.slane %v1127_v57, 3 }
  0xc0   : > { %2952 = vmatmul.msk.bf16.vlgmr.msrb.gmra.mxu3 %vm451_vm0, %v4229_v63  ;;  %2961 = vmatmul.msk.bf16.vlgmr.msra.gmra.mxu2 %vm451_vm0, %v4119_v45 }
  0xc1   : > { %1150 = vmatpush.bf16.msrb.mxu3 %v4081_v34 }
  0xc5   : > { %1151 = vmatpush.bf16.msrb.mxu3 %v4100_v40 }
  0xc8   : > { %2943 = vmatmul.msk.bf16.vlgmr.msrb.gmra.mxu0 %vm451_vm0, %v724_v3  ;;  %2958 = vmatmul.msk.bf16.vlgmr.msra.gmra.mxu1 %vm451_vm0, %v4021_v9  ;;  %v727_v9 = vor.u32 %v725_v26, %v723_v2  ;;  %v4296_v26 = vpop.f32.mrf.mxu2 }
  0xc9   : > { %1053 = vmatpush.bf16.msrb.mxu0 %v4090_v35  ;;  %1152 = vmatpush.bf16.msrb.mxu3 %v4125_v46 }
  0xca   : > { %v731_v11 = vsel %vm714_vm2, %v727_v9, %v730_v10 }
  0xcd   : > { %1054 = vmatpush.bf16.msrb.mxu0 %v4107_v41  ;;  %1153 = vmatpush.bf16.msrb.mxu3 %v4140_v48 }
  0xd0   : > { %2953 = vmatmul.msk.bf16.gmra.mxu3 %vm451_vm0, %v4252_v8  ;;  %2962 = vmatmul.msk.bf16.gmra.mxu2 %vm451_vm0, %v4131_v47  ;;  %v606_v29 = vpop.f32.mrf.mxu2  ;;  %v1133_v47 = vrot.slane %v4073_v33, 3 }
  0xd1   : > { %1055 = vmatpush.bf16.msrb.mxu0 %v4172_v49 }
  0xd2   : > { %v1134_v52 = vsel %vm1129_vm3, %v1131_v37, %v1133_v47  ;;  %v1136_v1 = vsel %vm1129_vm3, %v1133_v47, %v1135_v61 }
  0xd5   : > { %1056 = vmatpush.bf16.msrb.mxu0 %v4178_v50 }
  0xd8   : > { %2944 = vmatmul.msk.bf16.gmra.mxu0 %vm451_vm0, %v731_v11  ;;  %2959 = vmatmul.msk.bf16.gmra.mxu1 %vm451_vm0, %v4028_v14  ;;  %v993_v14 = vpop.permute.xlu0 %992  ;;  %v4312_v38 = vpop.f32.mrf.mxu2 }
  0xe0   : > { %2954 = vmatmul.msk.bf16.gmra.mxu3 %vm451_vm0, %v4271_v15  ;;  %2963 = vmatmul.msk.bf16.gmra.mxu2 %vm451_vm0, %v4116_v44 }
  0xe8   : > { %2945 = vmatmul.msk.bf16.gmra.mxu0 %vm451_vm0, %v734_v16  ;;  %2960 = vmatmul.msk.bf16.gmra.mxu1 %vm451_vm0, %v4046_v21  ;;  %v4294_v21 = vpop.f32.mrf.mxu1 }
  0xf0   : > { %2964 = vmatmul.msk.bf16.vlgmr.msra.gmra.mxu3 %vm451_vm0, %v993_v14  ;;  %2973 = vmatmul.msk.bf16.vlgmr.msrb.gmra.mxu2 %vm451_vm0, %v993_v14  ;;  %v537_v28 = vpop.f32.mrf.mxu1 }
  0xf8   : > { %2955 = vmatmul.msk.bf16.vlgmr.msra.gmra.mxu0 %vm451_vm0, %v4185_v51  ;;  %2970 = vmatmul.msk.bf16.vlgmr.msrb.gmra.mxu1 %vm451_vm0, %v4185_v51  ;;  %v4308_v35 = vpop.f32.mrf.mxu1 }
 0x100   : > { %2965 = vmatmul.msk.bf16.gmra.mxu3 %vm451_vm0, %v995_v25  ;;  %2974 = vmatmul.msk.bf16.gmra.mxu2 %vm451_vm0, %v995_v25 }
 0x108   : > { %2956 = vmatmul.msk.bf16.gmra.mxu0 %vm451_vm0, %v4201_v53  ;;  %2971 = vmatmul.msk.bf16.gmra.mxu1 %vm451_vm0, %v4201_v53 }
 0x110   : > { %2966 = vmatmul.msk.bf16.gmra.mxu3 %vm451_vm0, %v997_v27  ;;  %2975 = vmatmul.msk.bf16.gmra.mxu2 %vm451_vm0, %v997_v27 }
 0x113   : > { %v677_v30 = vpop.f32.mrf.mxu3  ;;  %v801_v45 = vpop.f32.mrf.mxu2 }
 0x115   : > { %v470_v31 = vpop.f32.mrf.mxu0  ;;  %v777_v43 = vpop.f32.mrf.mxu1 }
 0x116   : > { %v528_v32 = vadd.f32 %v527_v17, %v470_v31  ;;  %v4353_v17 = vld [vmem:[%s4957_s2] ss:$0 sm:$0xff] }
 0x118   : > { %v611_v34 = vadd.f32 %v596_v19, %v528_v32  ;;  %2957 = vmatmul.msk.bf16.gmra.mxu0 %vm451_vm0, %v4217_v55  ;;  %2972 = vmatmul.msk.bf16.gmra.mxu1 %vm451_vm0, %v4217_v55 }
 0x11a   : > { %v4314_v39 = vadd.f32 %v677_v30, %v611_v34 }
 0x11b   : > { %v4316_v40 = vpop.f32.mrf.mxu3  ;;  %v803_v53 = vpop.f32.mrf.mxu2 }
 0x11d   : > { %v4318_v41 = vpop.f32.mrf.mxu0  ;;  %v779_v50 = vpop.f32.mrf.mxu1 }
 0x120   : > { %2976 = vmatmul.msk.bf16.vlgmr.msrb.gmra.mxu3 %vm451_vm0, %v1132_v42 }
 0x123   : > { %v682_v44 = vpop.f32.mrf.mxu3  ;;  %v806_v60 = vpop.f32.mrf.mxu2 }
 0x125   : > { %v475_v13 = vpop.f32.mrf.mxu0  ;;  %v782_v59 = vpop.f32.mrf.mxu1 }
 0x126   : > { %v533_v46 = vadd.f32 %v532_v23, %v475_v13 }
 0x128   : > { %v613_v18 = vadd.f32 %v601_v24, %v533_v46  ;;  %2967 = vmatmul.msk.bf16.vlgmr.msrb.gmra.mxu0 %vm451_vm0, %v4229_v63 }
 0x12a   : > { %v4325_v48 = vadd.f32 %v682_v44, %v613_v18 }
 0x12b   : > { %v4327_v49 = vpop.f32.mrf.mxu3  ;;  %v808_v3 = vpop.f32.mrf.mxu2 }
 0x12d   : > { %v4329_v51 = vpop.f32.mrf.mxu0  ;;  %v784_v2 = vpop.f32.mrf.mxu1 }
 0x130   : > { %2977 = vmatmul.msk.bf16.gmra.mxu3 %vm451_vm0, %v1134_v52 }
 0x133   : > { %v687_v55 = vpop.f32.mrf.mxu3  ;;  %v4348_v10 = vpop.f32.mrf.mxu2 }
 0x135   : > { %v480_v56 = vpop.f32.mrf.mxu0 }
 0x136   : > { %v538_v58 = vadd.f32 %v537_v28, %v480_v56 }
 0x138   : > { %v615_v33 = vadd.f32 %v606_v29, %v538_v58  ;;  %2968 = vmatmul.msk.bf16.gmra.mxu0 %vm451_vm0, %v4252_v8  ;;  %v4346_v8 = vpop.f32.mrf.mxu1 }
 0x13a   : > { %v4336_v62 = vadd.f32 %v687_v55, %v615_v33 }
 0x13b   : > { %v4338_v63 = vpop.f32.mrf.mxu3  ;;  %v813_v28 = vpop.f32.mrf.mxu2 }
 0x13d   : > { %v4340_v0 = vpop.f32.mrf.mxu0 }
 0x140   : > { %2978 = vmatmul.msk.bf16.gmra.mxu3 %vm451_vm0, %v1136_v1  ;;  %v789_v25 = vpop.f32.mrf.mxu1 }
 0x143   : > { %v860_v4 = vpop.f32.mrf.mxu3 }
 0x145   : > { %v753_v5 = vpop.f32.mrf.mxu0 }
 0x146   : > { %v778_v6 = vadd.f32 %v777_v43, %v753_v5 }
 0x148   : > { %2969 = vmatmul.msk.bf16.gmra.mxu0 %vm451_vm0, %v4271_v15  ;;  %v816_v7 = vadd.f32 %v801_v45, %v778_v6  ;;  %v926_v44 = vpop.f32.mrf.mxu1  ;;  %v971_v45 = vpop.f32.mrf.mxu2 }
 0x14a   : > { %v875_v12 = vadd.f32 %v860_v4, %v816_v7 }
 0x14b   : > { %v862_v9 = vpop.f32.mrf.mxu3 }
 0x14c   : > { %v881_v23 = vadd.f32 %v4353_v17, %v875_v12 }
 0x14d   : > { %v755_v11 = vpop.f32.mrf.mxu0 }
 0x14e   : > { %v780_v16 = vadd.f32 %v779_v50, %v755_v11  ;;  %v887_v30 = vmax.f32 %v881_v23, 0.0 }
 0x150   : > { %v817_v19 = vadd.f32 %v803_v53, %v780_v16  ;;  %v928_v56 = vpop.f32.mrf.mxu1  ;;  %v973_v57 = vpop.f32.mrf.mxu2 }
 0x152   : > { %v876_v14 = vadd.f32 %v862_v9, %v817_v19 }
 0x153   : > { %v865_v24 = vpop.f32.mrf.mxu3 }
 0x154   : > { %v882_v15 = vadd.f32 %v4353_v17, %v876_v14 }
 0x155   : > { %v758_v27 = vpop.f32.mrf.mxu0 }
 0x156   : > { %v783_v29 = vadd.f32 %v782_v59, %v758_v27  ;;  %v888_v31 = vmax.f32 %v882_v15, 0.0 }
 0x158   : > { %v3754_v32 = vpack.i.bf16 %v888_v31, %v887_v30  ;;  %v818_v34 = vadd.f32 %v806_v60, %v783_v29  ;;  %v931_v60 = vpop.f32.mrf.mxu1  ;;  %v976_v61 = vpop.f32.mrf.mxu2 }
 0x15a   : > { %3755 = vrot.lane.b32.xlu0 %v3754_v32, %s3867_s15  ;;  %v877_v42 = vadd.f32 %v865_v24, %v818_v34 }
 0x15b   : > { %v867_v36 = vpop.f32.mrf.mxu3 }
 0x15c   : > { %v883_v18 = vadd.f32 %v4353_v17, %v877_v42 }
 0x15d   : > { %v760_v37 = vpop.f32.mrf.mxu0 }
 0x15e   : > { %v785_v43 = vadd.f32 %v784_v2, %v760_v37  ;;  %v889_v53 = vmax.f32 %v883_v18, 0.0 }
 0x160   : > { %v819_v13 = vadd.f32 %v808_v3, %v785_v43  ;;  %v933_v5 = vpop.f32.mrf.mxu1  ;;  %v978_v7 = vpop.f32.mrf.mxu2 }
 0x162   : > { %v878_v46 = vadd.f32 %v867_v36, %v819_v13 }
 0x163   : > { %v870_v47 = vpop.f32.mrf.mxu3 }
 0x164   : > { %v884_v50 = vadd.f32 %v4353_v17, %v878_v46 }
 0x165   : > { %v763_v52 = vpop.f32.mrf.mxu0 }
 0x166   : > { %v890_v54 = vmax.f32 %v884_v50, 0.0  ;;  %v788_v43 = vadd.f32 %v4346_v8, %v763_v52 }
 0x168   : > { %v3759_v55 = vpack.i.bf16 %v890_v54, %v889_v53  ;;  %v936_v30 = vpop.f32.mrf.mxu1  ;;  %v981_v31 = vpop.f32.mrf.mxu2  ;;  %v820_v50 = vadd.f32 %v4348_v10, %v788_v43 }
 0x16a   : > { %3760 = vrot.lane.b32.xlu1 %v3759_v55, %s3867_s15 }
 0x16b   : > { %v872_v58 = vpop.f32.mrf.mxu3 }
 0x16d   : > { %v765_v59 = vpop.f32.mrf.mxu0 }
 0x16e   : > { %v790_v37 = vadd.f32 %v789_v25, %v765_v59  ;;  %v879_v25 = vadd.f32 %v870_v47, %v820_v50 }
 0x170   : > { %v821_v13 = vadd.f32 %v813_v28, %v790_v37  ;;  %v938_v18 = vpop.f32.mrf.mxu1  ;;  %v983_v53 = vpop.f32.mrf.mxu2  ;;  %v885_v28 = vadd.f32 %v4353_v17, %v879_v25 }
 0x173   : > { %v1016_v33 = vpop.f32.mrf.mxu3 }
 0x175   : > { %v902_v1 = vpop.f32.mrf.mxu0 }
 0x176   : > { %v927_v2 = vadd.f32 %v926_v44, %v902_v1 }
 0x178   : > { %v986_v3 = vadd.f32 %v971_v45, %v927_v2  ;;  %v1082_v10 = vpop.f32.mrf.mxu1  ;;  %v1106_v2 = vpop.f32.mrf.mxu2 }
 0x17a   : > { %v1031_v9 = vadd.f32 %v1016_v33, %v986_v3 }
 0x17b   : > { %v1018_v4 = vpop.f32.mrf.mxu3 }
 0x17c   : > { %v1037_v19 = vadd.f32 %v4353_v17, %v1031_v9 }
 0x17d   : > { %v904_v6 = vpop.f32.mrf.mxu0 }
 0x17e   : > { %v929_v11 = vadd.f32 %v928_v56, %v904_v6  ;;  %v1043_v27 = vmax.f32 %v1037_v19, 0.0 }
 0x180   : > { %v987_v12 = vadd.f32 %v973_v57, %v929_v11  ;;  %v880_v57 = vadd.f32 %v872_v58, %v821_v13  ;;  %v1084_v47 = vpop.f32.mrf.mxu1  ;;  %v1108_v9 = vpop.f32.mrf.mxu2 }
 0x182   : > { %v1032_v16 = vadd.f32 %v1018_v4, %v987_v12  ;;  %v886_v52 = vadd.f32 %v4353_v17, %v880_v57 }
 0x183   : > { %v1021_v14 = vpop.f32.mrf.mxu3 }
 0x184   : > { %v1038_v23 = vadd.f32 %v4353_v17, %v1032_v16  ;;  %v892_v3 = vmax.f32 %v886_v52, 0.0 }
 0x185   : > { %v907_v24 = vpop.f32.mrf.mxu0 }
 0x186   : > { %v932_v15 = vadd.f32 %v931_v60, %v907_v24  ;;  %v1044_v29 = vmax.f32 %v1038_v23, 0.0 }
 0x188   : > { %v3764_v32 = vpack.i.bf16 %v1044_v29, %v1043_v27  ;;  %v988_v34 = vadd.f32 %v976_v61, %v932_v15  ;;  %v1087_v27 = vpop.f32.mrf.mxu1  ;;  %v1111_v29 = vpop.f32.mrf.mxu2 }
 0x18a   : > { %3765 = vrot.lane.b32.xlu2 %v3764_v32, %s3866_s22  ;;  %v1033_v44 = vadd.f32 %v1021_v14, %v988_v34 }
 0x18b   : > { %v1023_v36 = vpop.f32.mrf.mxu3 }
 0x18c   : > { %v1039_v55 = vadd.f32 %v4353_v17, %v1033_v44 }
 0x18d   : > { %v909_v42 = vpop.f32.mrf.mxu0 }
 0x18e   : > { %v934_v45 = vadd.f32 %v933_v5, %v909_v42  ;;  %v1045_v59 = vmax.f32 %v1039_v55, 0.0  ;;  %v891_v5 = vmax.f32 %v885_v28, 0.0 }
 0x190   : > { %v989_v46 = vadd.f32 %v978_v7, %v934_v45  ;;  %v3784_v58 = vpack.i.bf16 %v892_v3, %v891_v5  ;;  %v1089_v57 = vpop.f32.mrf.mxu1 }
 0x192   : > { %v1034_v54 = vadd.f32 %v1023_v36, %v989_v46 }
 0x193   : > { %v1026_v56 = vpop.f32.mrf.mxu3 }
 0x194   : > { %v1040_v60 = vadd.f32 %v4353_v17, %v1034_v54 }
 0x195   : > { %v912_v33 = vpop.f32.mrf.mxu0 }
 0x196   : > { %v1046_v61 = vmax.f32 %v1040_v60, 0.0  ;;  %v937_v23 = vadd.f32 %v936_v30, %v912_v33  ;;  %v1113_v60 = vpop.f32.mrf.mxu2 }
 0x198   : > { %v3769_v8 = vpack.i.bf16 %v1046_v61, %v1045_v59  ;;  %v990_v36 = vadd.f32 %v981_v31, %v937_v23 }
 0x19a   : > { %3770 = vrot.lane.b32.xlu0 %v3769_v8, %s3866_s22  ;;  %v1035_v46 = vadd.f32 %v1026_v56, %v990_v36 }
 0x19b   : > { %v1028_v1 = vpop.f32.mrf.mxu3 }
 0x19c   : > { %v1041_v31 = vadd.f32 %v4353_v17, %v1035_v46  ;;  %v3625_v46 = vld [vmem:[%s4958_s3 + $0xf0] sm:$0xff] }
 0x19d   : > { %v914_v4 = vpop.f32.mrf.mxu0 }
 0x19e   : > { %v939_v19 = vadd.f32 %v938_v18, %v914_v4  ;;  %v1047_v56 = vmax.f32 %v1041_v31, 0.0  ;;  %v1116_v3 = vpop.f32.mrf.mxu2  ;;  %v3607_v31 = vld [vmem:[%s4958_s3 + $0x60] sm:$0xff] }
 0x1a0   : > { %v991_v32 = vadd.f32 %v983_v53, %v939_v19 }
 0x1a2   : > { %3785 = vrot.lane.b32.xlu0 %v3784_v58, %s3867_s15  ;;  %v1036_v44 = vadd.f32 %v1028_v1, %v991_v32 }
 0x1a3   : > { %v1155_v6 = vpop.f32.mrf.mxu3 }
 0x1a4   : > { %v1042_v55 = vadd.f32 %v4353_v17, %v1036_v44  ;;  %v3610_v44 = vld [vmem:[%s4958_s3 + $0x78] sm:$0xff] }
 0x1a5   : > { %v1058_v7 = vpop.f32.mrf.mxu0  ;;  %1390 = vmatpush.bf16.msra.mxu0 %v3610_v44 }
 0x1a6   : > { %v1083_v11 = vadd.f32 %v1082_v10, %v1058_v7  ;;  %v1048_v25 = vmax.f32 %v1042_v55, 0.0  ;;  %v3608_v55 = vld [vmem:[%s4958_s3 + $0x68] sm:$0xff] }
 0x1a8   : > { %v1121_v12 = vadd.f32 %v1106_v2, %v1083_v11  ;;  %v3789_v28 = vpack.i.bf16 %v1048_v25, %v1047_v56  ;;  %v1092_v2 = vpop.f32.mrf.mxu1  ;;  %v3626_v11 = vld [vmem:[%s4958_s3 + $0xf8] sm:$0xff] }
 0x1a9   : > { %1673 = vmatpush.bf16.msra.mxu3 %v3626_v11  ;;  %v3614_v25 = vld [vmem:[%s4958_s3 + $0x98] sm:$0xff] }
 0x1aa   : > { %v1170_v24 = vadd.f32 %v1155_v6, %v1121_v12  ;;  %v3606_v56 = vld [vmem:[%s4958_s3 + $0x58] sm:$0xff] }
 0x1ab   : > { %v1157_v16 = vpop.f32.mrf.mxu3 }
 0x1ac   : > { %v1176_v42 = vadd.f32 %v4353_v17, %v1170_v24 }
 0x1ad   : > { %v1060_v14 = vpop.f32.mrf.mxu0  ;;  %1674 = vmatpush.bf16.msra.mxu3 %v3625_v46 }
 0x1ae   : > { %v1085_v15 = vadd.f32 %v1084_v47, %v1060_v14  ;;  %v1182_v18 = vmax.f32 %v1176_v42, 0.0 }
 0x1b0   : > { %v1122_v34 = vadd.f32 %v1108_v9, %v1085_v15  ;;  %v3618_v9 = vld [vmem:[%s4958_s3 + $0xb8] sm:$0xff]  ;;  %v1094_v19 = vpop.f32.mrf.mxu1  ;;  %v1118_v15 = vpop.f32.mrf.mxu2 }
 0x1b1   : > { %1569 = vmatpush.bf16.msra.mxu2 %v3618_v9 }
 0x1b2   : > { %v1171_v37 = vadd.f32 %v1157_v16, %v1122_v34 }
 0x1b3   : > { %v1160_v43 = vpop.f32.mrf.mxu3 }
 0x1b4   : > { %v1177_v45 = vadd.f32 %v4353_v17, %v1171_v37 }
 0x1b5   : > { %v1063_v13 = vpop.f32.mrf.mxu0 }
 0x1b6   : > { %v1088_v50 = vadd.f32 %v1087_v27, %v1063_v13  ;;  %v1183_v54 = vmax.f32 %v1177_v45, 0.0  ;;  %v3602_v45 = vld [vmem:[%s4958_s3 + $0x38] sm:$0xff]  ;;  %v3617_v13 = vld [vmem:[%s4958_s3 + $0xb0] sm:$0xff] }
 0x1b7   : > { %1461 = vmatpush.bf16.msra.mxu1 %v3602_v45  ;;  %1570 = vmatpush.bf16.msra.mxu2 %v3617_v13 }
 0x1b8   : > { %v3774_v30 = vpack.i.bf16 %v1183_v54, %v1182_v18  ;;  %v1123_v53 = vadd.f32 %v1111_v29, %v1088_v50  ;;  %v3609_v50 = vld [vmem:[%s4958_s3 + $0x70] sm:$0xff]  ;;  %v3616_v54 = vld [vmem:[%s4958_s3 + $0xa8] sm:$0xff] }
 0x1b9   : > { %v3601_v18 = vld [vmem:[%s4958_s3 + $0x30] sm:$0xff]  ;;  %1391 = vmatpush.bf16.msra.mxu0 %v3609_v50 }
 0x1ba   : > { %3775 = vrot.lane.b32.xlu1 %v3774_v30, %s3868_s14  ;;  %v1172_v61 = vadd.f32 %v1160_v43, %v1123_v53  ;;  %v3624_v30 = vld [vmem:[%s4958_s3 + $0xe8] sm:$0xff]  ;;  %v3623_v53 = vld [vmem:[%s4958_s3 + $0xe0] sm:$0xff] }
 0x1bb   : > { %v1162_v33 = vpop.f32.mrf.mxu3  ;;  %1462 = vmatpush.bf16.msra.mxu1 %v3601_v18  ;;  %1571 = vmatpush.bf16.msra.mxu2 %v3616_v54 }
 0x1bc   : > { %v1178_v10 = vadd.f32 %v4353_v17, %v1172_v61  ;;  %1675 = vmatpush.bf16.msra.mxu3 %v3624_v30  ;;  %v3598_v61 = vld [vmem:[%s4958_s3 + $0x18] sm:$0xff] }
 0x1bd   : > { %v1065_v59 = vpop.f32.mrf.mxu0  ;;  %1392 = vmatpush.bf16.msra.mxu0 %v3608_v55  ;;  %v706_v55 = vadd.f32 %v4353_v17, %v4336_v62 }
 0x1be   : > { %v1090_v8 = vadd.f32 %v1089_v57, %v1065_v59  ;;  %v1184_v6 = vmax.f32 %v1178_v10, 0.0  ;;  %v3600_v57 = vld [vmem:[%s4958_s3 + $0x28] sm:$0xff]  ;;  %v3622_v59 = vld [vmem:[%s4958_s3 + $0xd8] sm:$0xff] }
 0x1bf   : > { %1463 = vmatpush.bf16.msra.mxu1 %v3600_v57  ;;  %v3596_v10 = vld [vmem:[%s4958_s3 + $0x8] sm:$0xff] }
 0x1c0   : > { %v1124_v52 = vadd.f32 %v1113_v60, %v1090_v8  ;;  %v3615_v60 = vld [vmem:[%s4958_s3 + $0xa0] sm:$0xff]  ;;  %1676 = vmatpush.bf16.msra.mxu3 %v3623_v53  ;;  %v3597_v8 = vld [vmem:[%s4958_s3 + $0x10] sm:$0xff] }
 0x1c1   : > { %1572 = vmatpush.bf16.msra.mxu2 %v3615_v60  ;;  %1393 = vmatpush.bf16.msra.mxu0 %v3607_v31 }
 0x1c2   : > { %v1173_v1 = vadd.f32 %v1162_v33, %v1124_v52  ;;  %3790 = vrot.lane.b32.xlu1 %v3789_v28, %s3866_s22  ;;  %v3599_v33 = vld [vmem:[%s4958_s3 + $0x20] sm:$0xff]  ;;  %v3613_v52 = vld [vmem:[%s4958_s3 + $0x90] sm:$0xff]  ;;  %s3822_s22 = scalar_lea.hbm %s4966_s11, 2 }
 0x1c3   : > { %v1165_v58 = vpop.f32.mrf.mxu3  ;;  %1464 = vmatpush.bf16.msra.mxu1 %v3599_v33  ;;  %v3621_v28 = vld [vmem:[%s4958_s3 + $0xd0] sm:$0xff]  ;;  %p3824_p1 = scmp.lt.s32.totalorder %s3822_s22, %s3818_s25 }
 0x1c4   : > { %v1179_v4 = vadd.f32 %v4353_v17, %v1173_v1  ;;  %1677 = vmatpush.bf16.msra.mxu3 %v3622_v59  ;;  %v3605_v1 = vld [vmem:[%s4958_s3 + $0x50] sm:$0xff] }
 0x1c5   : > { %v1068_v5 = vpop.f32.mrf.mxu0  ;;  %1573 = vmatpush.bf16.msra.mxu2 %v3614_v25  ;;  %1394 = vmatpush.bf16.msra.mxu0 %v3606_v56  ;;  %p3825_p2 = por %p3824_p1, %p3823_p0 }
 0x1c6   : > { %v1185_v47 = vmax.f32 %v1179_v4, 0.0  ;;  %v1093_v7 = vadd.f32 %v1092_v2, %v1068_v5  ;;  %v3620_v2 = vld [vmem:[%s4958_s3 + $0xc8] sm:$0xff] }
 0x1c7   : > { %1465 = vmatpush.bf16.msra.mxu1 %v3598_v61  ;;  %v3612_v4 = vld [vmem:[%s4958_s3 + $0x88] sm:$0xff]  ;;  %p3826_p3 = pnand %p3825_p2, %p3821_p13 }
 0x1c8   : > { %v3779_v12 = vpack.i.bf16 %v1185_v47, %v1184_v6  ;;  %v1125_v16 = vadd.f32 %v1116_v3, %v1093_v7  ;;  %1678 = vmatpush.bf16.msra.mxu3 %v3621_v28  ;;  %v3595_v3 = vld [vmem:[%s4958_s3] sm:$0xff]  ;;  %v3604_v5 = vld [vmem:[%s4958_s3 + $0x48] sm:$0xff]  ;;  %v535_v47 = vadd.f32 %v4294_v21, %v4329_v51  ;;  %v704_v21 = vadd.f32 %v4353_v17, %v4325_v48 }
 0x1c9   : > { %1574 = vmatpush.bf16.msra.mxu2 %v3613_v52  ;;  %1395 = vmatpush.bf16.msra.mxu0 %v3605_v1  ;;  %v3611_v6 = vld [vmem:[%s4958_s3 + $0x80] sm:$0xff]  ;;  %v712_v1 = vmax.f32 %v706_v55, 0.0  ;;  %v3634_v55 = vld [vmem:[%s4960_s5 + $0x38] sm:$0xff] }
 0x1ca   : > { %3780 = vrot.lane.b32.xlu2 %v3779_v12, %s3868_s14  ;;  %v1174_v23 = vadd.f32 %v1165_v58, %v1125_v16  ;;  %v3619_v58 = vld [vmem:[%s4958_s3 + $0xc0] sm:$0xff]  ;;  %v614_v9 = vadd.f32 %v4296_v26, %v535_v47  ;;  %v530_v12 = vadd.f32 %v4284_v20, %v4318_v41  ;;  %v710_v41 = vmax.f32 %v704_v21, 0.0 }
 0x1cb   : > { %v1167_v27 = vpop.f32.mrf.mxu3  ;;  %1466 = vmatpush.bf16.msra.mxu1 %v3597_v8  ;;  %v3603_v7 = vld [vmem:[%s4958_s3 + $0x40] sm:$0xff] }
 0x1cc   : > { %v1180_v32 = vadd.f32 %v4353_v17, %v1174_v23  ;;  %1679 = vmatpush.bf16.msra.mxu3 %v3620_v2  ;;  %v3756_v11 = vpop.permute.xlu0 %3755  ;;  %v695_v16 = vadd.f32 %v4327_v49, %v614_v9  ;;  %v612_v23 = vadd.f32 %v4286_v22, %v530_v12 }
 0x1cd   : > { %v1070_v14 = vpop.f32.mrf.mxu0  ;;  %1575 = vmatpush.bf16.msra.mxu2 %v3612_v4  ;;  %1396 = vmatpush.bf16.msra.mxu0 %v3604_v5  ;;  %v3757_v13 = vunpack.i.l.bf16 %v3756_v11  ;;  %v3758_v46 = vunpack.i.h.bf16 %v3756_v11 }
 0x1ce   : > { %v1095_v24 = vadd.f32 %v1094_v19, %v1070_v14  ;;  %v1186_v37 = vmax.f32 %v1180_v32, 0.0  ;;  %v705_v51 = vadd.f32 %v4353_v17, %v695_v16  ;;  %v693_v20 = vadd.f32 %v4316_v40, %v612_v23 }
 0x1cf   : > { %1467 = vmatpush.bf16.msra.mxu1 %v3596_v10 }
 0x1d0   : > { %v1126_v29 = vadd.f32 %v1118_v15, %v1095_v24  ;;  %1680 = vmatpush.bf16.msra.mxu3 %v3619_v58  ;;  %v540_v15 = vadd.f32 %v4308_v35, %v4340_v0  ;;  %v711_v49 = vmax.f32 %v705_v51, 0.0  ;;  %v702_v35 = vadd.f32 %v4353_v17, %v4314_v39 }
 0x1d1   : > { %1576 = vmatpush.bf16.msra.mxu2 %v3611_v6  ;;  %1397 = vmatpush.bf16.msra.mxu0 %v3603_v7 }
 0x1d2   : > { %v1175_v34 = vadd.f32 %v1167_v27, %v1126_v29  ;;  %v708_v18 = vmax.f32 %v702_v35, 0.0 }
 0x1d3   : > { %1468 = vmatpush.bf16.msra.mxu1 %v3595_v3 }
 0x1d4   : > { %v1181_v36 = vadd.f32 %v4353_v17, %v1175_v34  ;;  %v616_v34 = vadd.f32 %v4312_v38, %v540_v15  ;;  %v1261_v60 = vsel %vm1260_vm4, %v708_v18, %v3757_v13 }
 0x1d5   : > { %1783 = vmatpush.bf16.msrb.mxu0 %v3634_v55  ;;  %v3643_v55 = vld [vmem:[%s4960_s5 + $0x80] sm:$0xff] }
 0x1d6   : > { %v1187_v42 = vmax.f32 %v1181_v36, 0.0  ;;  %v697_v45 = vadd.f32 %v4338_v63, %v616_v34 }
 0x1d8   : > { %v3794_v43 = vpack.i.bf16 %v1187_v42, %v1186_v37  ;;  %v707_v57 = vadd.f32 %v4353_v17, %v697_v45 }
 0x1da   : > { %3795 = vrot.lane.b32.xlu2 %v3794_v43, %s3868_s14  ;;  %v703_v43 = vadd.f32 %v4353_v17, %v693_v20  ;;  %v713_v2 = vmax.f32 %v707_v57, 0.0  ;;  %v3630_v57 = vld [vmem:[%s4960_s5 + $0x18] sm:$0xff]  ;;  %s377_s14 = sand.u32 1, %s3856_s18  }
 0x1db   : > { %1827 = vmatpush.bf16.msrb.mxu1 %v3630_v57  ;;  %s378_s13 = scalar_lea.vmem [#allocation2], %s377_s14  ;;  %s2771_s24 = scalar_lea.sflag [#allocation3], %s377_s14 }
 0x1dc   : > { %v3761_v14 = vpop.permute.xlu1 %3760  ;;  %v709_v39 = vmax.f32 %v703_v43, 0.0  ;;  %s2781_s15 = sshll.u32 %s378_s13, 4  ;;  %s2782_s15 = int_to_ptr.vmem [resolvable:$true] %s2781_s15 }
 0x1dd   : > { %v3763_v26 = vunpack.i.h.bf16 %v3761_v14  ;;  %v3762_v27 = vunpack.i.l.bf16 %v3761_v14 }
 0x1de   : > { %v1262_v33 = vsel %vm1260_vm4, %v709_v39, %v3758_v46 }
 0x1df   : > { %v1263_v48 = vsel %vm1260_vm4, %v710_v41, %v3762_v27  ;;  %v1264_v36 = vsel %vm1260_vm4, %v711_v49, %v3763_v26 }
 0x1e4   : > { %v3766_v19 = vpop.permute.xlu2 %3765 }
 0x1e5   : > { %v3768_v54 = vunpack.i.h.bf16 %v3766_v19  ;;  %v3767_v30 = vunpack.i.l.bf16 %v3766_v19 }
 0x1e7   : > { %v1267_v61 = vsel %vm451_vm0, %v1261_v60, %v3767_v30  ;;  %v1268_v8 = vsel %vm451_vm0, %v1262_v33, %v3768_v54  ;;  %v3629_v60 = vld [vmem:[%s4960_s5 + $0x10] sm:$0xff]  ;;  %v3638_v33 = vld [vmem:[%s4960_s5 + $0x58] sm:$0xff] }
 0x1e8   : > { %1828 = vmatpush.bf16.msrb.mxu1 %v3629_v60  ;;  %1888 = vmatpush.bf16.msrb.mxu2 %v3638_v33  ;;  %v3657_v60 = vld [vmem:[%s4960_s5 + $0xf0] sm:$0xff] }
 0x20c   : > { %v3771_v24 = vpop.permute.xlu0 %3770 }
 0x20d   : > { %v3773_v29 = vunpack.i.h.bf16 %v3771_v24  ;;  %v3772_v32 = vunpack.i.l.bf16 %v3771_v24 }
 0x20f   : > { %v1269_v0 = vsel %vm451_vm0, %v1263_v48, %v3772_v32  ;;  %v1270_v40 = vsel %vm451_vm0, %v1264_v36, %v3773_v29 }
 0x214   : > { %v3786_v53 = vpop.permute.xlu0 %3785 }
 0x215   : > { %v3788_v52 = vunpack.i.h.bf16 %v3786_v53  ;;  %v3787_v62 = vunpack.i.l.bf16 %v3786_v53  ;;  %v3628_v53 = vld [vmem:[%s4960_s5 + $0x8] sm:$0xff] }
 0x216   : > { %1829 = vmatpush.bf16.msrb.mxu1 %v3628_v53 }
 0x217   : > { %v1265_v7 = vsel %vm1260_vm4, %v712_v1, %v3787_v62  ;;  %v1266_v9 = vsel %vm1260_vm4, %v713_v2, %v3788_v52  ;;  %v3641_v62 = vld [vmem:[%s4960_s5 + $0x70] sm:$0xff]  ;;  %v3631_v1 = vld [vmem:[%s4960_s5 + $0x20] sm:$0xff] }
 0x224   : > { %v3781_v22 = vpop.permute.xlu2 %3780 }
 0x225   : > { %v3783_v37 = vunpack.i.h.bf16 %v3781_v22  ;;  %v3782_v42 = vunpack.i.l.bf16 %v3781_v22 }
 0x227   : > { %v1276_v38 = vsel %vm1273_vm5, %v1269_v0, %v3782_v42  ;;  %v1277_v44 = vsel %vm1273_vm5, %v1270_v40, %v3783_v37 }
 0x228   : > { %v4504_v50 = vpack.c.bf16 %v1277_v44, %v1276_v38 }
 0x22a   : > { %v1328_v59 = vshrl.u32 %v4504_v50, 16  ;;  %v1324_v56 = vshll.u32 %v4504_v50, 16  ;;  %v1618_v3 = vrot.slane %v4504_v50, 3 }
 0x22c   : > { %v3776_v31 = vpop.permute.xlu1 %3775  ;;  %v1505_v4 = vrot.slane %v1328_v59, 2  ;;  %v1506_v47 = vrot.slane %v1324_v56, 3  ;;  %v1326_v27 = vrot.slane %v1324_v56, 1  ;;  %v3632_v56 = vld [vmem:[%s4960_s5 + $0x28] sm:$0xff] }
 0x22d   : > { %v3778_v63 = vunpack.i.h.bf16 %v3776_v31  ;;  %v3777_v25 = vunpack.i.l.bf16 %v3776_v31  ;;  %v3627_v31 = vld [vmem:[%s4960_s5] sm:$0xff] }
 0x22e   : > { %v1507_v32 = vor.u32 %v1506_v47, %v1505_v4  ;;  %v1330_v43 = vor.u32 %v1328_v59, %v1326_v27  ;;  %1830 = vmatpush.bf16.msrb.mxu1 %v3627_v31  ;;  %v3642_v59 = vld [vmem:[%s4960_s5 + $0x78] sm:$0xff]  ;;  %v3640_v4 = vld [vmem:[%s4960_s5 + $0x68] sm:$0xff] }
 0x22f   : > { %v1274_v17 = vsel %vm1273_vm5, %v1267_v61, %v3777_v25  ;;  %v1275_v28 = vsel %vm1273_vm5, %v1268_v8, %v3778_v63  ;;  %v3637_v61 = vld [vmem:[%s4960_s5 + $0x50] sm:$0xff]  ;;  %1951 = vmatpush.bf16.msrb.mxu3 %v3642_v59 }
 0x230   : > { %v1296_v10 = vpack.c.bf16 %v1275_v28, %v1274_v17  ;;  %1889 = vmatpush.bf16.msrb.mxu2 %v3637_v61  ;;  %v3636_v17 = vld [vmem:[%s4960_s5 + $0x48] sm:$0xff] }
 0x232   : > { %1469 = vmatmul.bf16.vlgmr.msra.gmra.mxu1 %v1296_v10  ;;  %v1617_v5 = vrot.slane %v1296_v10, 3  ;;  %v1317_v58 = vshrl.u32 %v1296_v10, 16  ;;  %v1319_v6 = vshll.u32 %v1296_v10, 16 }
 0x233   : > { %1952 = vmatpush.bf16.msrb.mxu3 %v3641_v62  ;;  %v3656_v62 = vld [vmem:[%s4960_s5 + $0xe8] sm:$0xff] }
 0x234   : > { %v3796_v11 = vpop.permute.xlu2 %3795  ;;  %v3791_v12 = vpop.permute.xlu1 %3790  ;;  %v1619_v16 = vsel %vm1129_vm3, %v1617_v5, %v1618_v3  ;;  %v1321_v19 = vrot.slane %v1319_v6, 1  ;;  %v1502_v14 = vrot.slane %v1317_v58, 2  ;;  %v1503_v23 = vrot.slane %v1319_v6, 3  ;;  %1890 = vmatpush.bf16.msrb.mxu2 %v3636_v17  ;;  %v3650_v6 = vld [vmem:[%s4960_s5 + $0xb8] sm:$0xff] }
 0x235   : > { %v3798_v21 = vunpack.i.h.bf16 %v3796_v11  ;;  %v3797_v51 = vunpack.i.l.bf16 %v3796_v11  ;;  %v3793_v24 = vunpack.i.h.bf16 %v3791_v12  ;;  %v3792_v15 = vunpack.i.l.bf16 %v3791_v12  ;;  %1681 = vmatmul.bf16.vlgmr.msra.gmra.mxu3 %v1619_v16  ;;  %2074 = vmatpush.bf16.msra.mxu1 %v3650_v6  ;;  %v4585_v11 = vld [vmem:[%s4959_s4] ss:$0 sm:$0xff]  ;;  %v3649_v16 = vld [vmem:[%s4960_s5 + $0xb0] sm:$0xff] }
 0x236   : > { %v1322_v26 = vor.u32 %v1321_v19, %v1317_v58  ;;  %v1504_v29 = vor.u32 %v1503_v23, %v1502_v14 }
 0x237   : > { %v1271_v20 = vsel %vm451_vm0, %v1265_v7, %v3792_v15  ;;  %v1272_v41 = vsel %vm451_vm0, %v1266_v9, %v3793_v24  ;;  %1953 = vmatpush.bf16.msrb.mxu3 %v3640_v4  ;;  %v3639_v7 = vld [vmem:[%s4960_s5 + $0x60] sm:$0xff]  ;;  %v3646_v15 = vld [vmem:[%s4960_s5 + $0x98] sm:$0xff] }
 0x238   : > { %v1278_v49 = vsel %vm1273_vm5, %v1271_v20, %v3797_v51  ;;  %v1279_v34 = vsel %vm1273_vm5, %v1272_v41, %v3798_v21  ;;  %v1327_v22 = vsel %vm714_vm2, %v1322_v26, %v1326_v27  ;;  %v1508_v48 = vsel %vm941_vm1, %v1504_v29, %v1507_v32  ;;  %v3648_v26 = vld [vmem:[%s4960_s5 + $0xa8] sm:$0xff]  ;;  %v3647_v20 = vld [vmem:[%s4960_s5 + $0xa0] sm:$0xff] }
 0x239   : > { %v1298_v36 = vpack.c.bf16 %v1278_v49, %v1278_v49  ;;  %v1501_v37 = vpack.c.bf16 %v1279_v34, %v1278_v49  ;;  %1398 = vmatmul.bf16.vlgmr.msra.gmra.mxu0 %v1327_v22  ;;  %1577 = vmatmul.bf16.vlgmr.msra.gmra.mxu2 %v1508_v48 }
 0x23a   : > { %2075 = vmatpush.bf16.msra.mxu1 %v3649_v16 }
 0x23b   : > { %v1620_v42 = vrot.slane %v1501_v37, 3  ;;  %v1332_v35 = vshll.u32 %v1298_v36, 16  ;;  %v1510_v0 = vshrl.u32 %v1501_v37, 16  ;;  %v1513_v40 = vshll.u32 %v1501_v37, 16  ;;  %1954 = vmatpush.bf16.msrb.mxu3 %v3639_v7 }
 0x23c   : > { %v1336_v30 = vshrl.u32 %v1298_v36, 16 }
 0x23d   : > { %v1621_v38 = vsel %vm1129_vm3, %v1618_v3, %v1620_v42  ;;  %v1334_v44 = vrot.slane %v1332_v35, 1  ;;  %v1512_v45 = vrot.slane %v1510_v0, 2  ;;  %v1515_v13 = vrot.slane %v1513_v40, 3  ;;  %v3635_v3 = vld [vmem:[%s4960_s5 + $0x40] sm:$0xff]  ;;  %v3654_v0 = vld [vmem:[%s4960_s5 + $0xd8] sm:$0xff] }
 0x23e   : > { %1891 = vmatpush.bf16.msrb.mxu2 %v3635_v3  ;;  %2076 = vmatpush.bf16.msra.mxu1 %v3648_v26 }
 0x23f   : > { %v1335_v46 = vsel %vm714_vm2, %v1330_v43, %v1334_v44  ;;  %v1516_v18 = vor.u32 %v1515_v13, %v1512_v45  ;;  %v1338_v39 = vor.u32 %v1336_v30, %v1334_v44  ;;  %v3644_v44 = vld [vmem:[%s4960_s5 + $0x88] sm:$0xff] }
 0x241   : > { %v1517_v54 = vsel %vm941_vm1, %v1507_v32, %v1516_v18  ;;  %v3645_v32 = vld [vmem:[%s4960_s5 + $0x90] sm:$0xff] }
 0x242   : > { %1474 = vmatmul.bf16.gmra.mxu1 %v4504_v50  ;;  %v3633_v50 = vld [vmem:[%s4960_s5 + $0x30] sm:$0xff]  ;;  %2137 = vmatpush.bf16.msra.mxu2 %v3654_v0  ;;  %v3660_v0 = vld [vmem:[%s4960_s5 + $0x108] sm:$0xff] }
 0x243   : > { %1784 = vmatpush.bf16.msrb.mxu0 %v3633_v50  ;;  %2077 = vmatpush.bf16.msra.mxu1 %v3647_v20  ;;  %v3652_v50 = vld [vmem:[%s4960_s5 + $0xc8] sm:$0xff] }
 0x245   : > { %1686 = vmatmul.bf16.gmra.mxu3 %v1621_v38 }
 0x247   : > { %1785 = vmatpush.bf16.msrb.mxu0 %v3632_v56 }
 0x249   : > { %1403 = vmatmul.bf16.gmra.mxu0 %v1335_v46  ;;  %1582 = vmatmul.bf16.gmra.mxu2 %v1517_v54  ;;  %v3653_v46 = vld [vmem:[%s4960_s5 + $0xd0] sm:$0xff] }
 0x24a   : > { %2138 = vmatpush.bf16.msra.mxu2 %v3653_v46 }
 0x24b   : > { %1786 = vmatpush.bf16.msrb.mxu0 %v3631_v1 }
 0x24e   : > { %2139 = vmatpush.bf16.msra.mxu2 %v3652_v50 }
 0x24f   : > { %2010 = vmatpush.bf16.msra.mxu0 %v3646_v15 }
 0x252   : > { %1479 = vmatmul.bf16.gmra.mxu1 %v1298_v36 }
 0x253   : > { %2011 = vmatpush.bf16.msra.mxu0 %v3645_v32 }
 0x255   : > { %1691 = vmatmul.bf16.gmra.mxu3 %v1620_v42 }
 0x257   : > { %2012 = vmatpush.bf16.msra.mxu0 %v3644_v44 }
 0x259   : > { %1408 = vmatmul.bf16.gmra.mxu0 %v1338_v39  ;;  %1587 = vmatmul.bf16.gmra.mxu2 %v1516_v18  ;;  %v3658_v18 = vld [vmem:[%s4960_s5 + $0xf8] sm:$0xff] }
 0x25a   : > { %2211 = vmatpush.bf16.msra.mxu3 %v3658_v18 }
 0x25b   : > { %2013 = vmatpush.bf16.msra.mxu0 %v3643_v55 }
 0x25e   : > { %2212 = vmatpush.bf16.msra.mxu3 %v3657_v60 }
 0x262   : > { %2213 = vmatpush.bf16.msra.mxu3 %v3656_v62 }
 0x2af   : > { %v1470_v63 = vpop.f32.mrf.mxu1 }
 0x2b6   : > { %v1399_v25 = vpop.f32.mrf.mxu0 }
 0x2b7   : > { %v1472_v8 = vpop.f32.mrf.mxu1  ;;  %v1471_v10 = vadd.f32 %v1470_v63, %v1399_v25 }
 0x2b8   : > { %v1682_v52 = vpop.f32.mrf.mxu3 }
 0x2bc   : > { %v1578_v28 = vpop.f32.mrf.mxu2 }
 0x2bd   : > { %v1592_v5 = vadd.f32 %v1578_v28, %v1471_v10 }
 0x2be   : > { %v1401_v2 = vpop.f32.mrf.mxu0 }
 0x2bf   : > { %v1475_v58 = vpop.f32.mrf.mxu1  ;;  %v1696_v9 = vadd.f32 %v1682_v52, %v1592_v5  ;;  %v1473_v12 = vadd.f32 %v1472_v8, %v1401_v2  ;;  %v3651_v52 = vld [vmem:[%s4960_s5 + $0xc0] sm:$0xff] }
 0x2c0   : > { %v1684_v47 = vpop.f32.mrf.mxu3  ;;  %2140 = vmatpush.bf16.msra.mxu2 %v3651_v52 }
 0x2c1   : > { %v1705_v21 = vadd.f32 %v4585_v11, %v1696_v9  ;;  %v3655_v9 = vld [vmem:[%s4960_s5 + $0xe0] sm:$0xff] }
 0x2c2   : > { %2214 = vmatpush.bf16.msra.mxu3 %v3655_v9 }
 0x2c3   : > { %v1710_v41 = vmax.f32 %v1705_v21, 0.0  ;;  %v3662_v21 = vld [vmem:[%s4960_s5 + $0x118] sm:$0xff] }
 0x2c4   : > { %v1580_v19 = vpop.f32.mrf.mxu2 }
 0x2c5   : > { %v1593_v14 = vadd.f32 %v1580_v19, %v1473_v12 }
 0x2c6   : > { %v1404_v23 = vpop.f32.mrf.mxu0 }
 0x2c7   : > { %v1697_v51 = vadd.f32 %v1684_v47, %v1593_v14  ;;  %v1477_v24 = vpop.f32.mrf.mxu1  ;;  %v1476_v48 = vadd.f32 %v1475_v58, %v1404_v23 }
 0x2c8   : > { %v1687_v27 = vpop.f32.mrf.mxu3 }
 0x2c9   : > { %v4598_v29 = vadd.f32 %v4585_v11, %v1697_v51 }
 0x2cb   : > { %v1711_v49 = vmax.f32 %v4598_v29, 0.0 }
 0x2cc   : > { %v1583_v34 = vpop.f32.mrf.mxu2 }
 0x2cd   : > { %v4609_v22 = vpack.c.bf16 %v1711_v49, %v1710_v41  ;;  %v1594_v37 = vadd.f32 %v1583_v34, %v1476_v48 }
 0x2ce   : > { %v1406_v36 = vpop.f32.mrf.mxu0 }
 0x2cf   : > { %v1480_v42 = vpop.f32.mrf.mxu1  ;;  %3197 = vmatmul.msk.bf16.vlgmr.msrb.gmra.mxu1 %vm451_vm0, %v4609_v22  ;;  %v1698_v40 = vadd.f32 %v1687_v27, %v1594_v37  ;;  %v1478_v43 = vadd.f32 %v1477_v24, %v1406_v36  ;;  %v1737_v31 = vshll.u32 %v4609_v22, 16  ;;  %v1735_v59 = vshrl.u32 %v4609_v22, 16  ;;  %v3661_v27 = vld [vmem:[%s4960_s5 + $0x110] sm:$0xff] }
 0x2d0   : > { %v1689_v35 = vpop.f32.mrf.mxu3  ;;  %v1851_v17 = vrot.slane %v4609_v22, 1 }
 0x2d1   : > { %v4626_v54 = vadd.f32 %v4585_v11, %v1698_v40  ;;  %v1739_v8 = vrot.slane %v1737_v31, 1  ;;  %v1910_v3 = vrot.slane %v1735_v59, 2  ;;  %v1911_v4 = vrot.slane %v1737_v31, 3 }
 0x2d2   : > { %v2033_v32 = vrot.slane %v1735_v59, 3  ;;  %v2034_v20 = vrot.slane %v1737_v31, 4 }
 0x2d3   : > { %v1712_v33 = vmax.f32 %v4626_v54, 0.0  ;;  %v1740_v58 = vor.u32 %v1739_v8, %v1735_v59  ;;  %v1912_v14 = vor.u32 %v1911_v4, %v1910_v3  ;;  %v1973_v54 = vrot.slane %v4609_v22, 3  ;;  %v3675_v4 = vld [vmem:[%s4962_s7 + $0x64] sm:$0xf] }
 0x2d4   : > { %v1585_v38 = vpop.f32.mrf.mxu2  ;;  %v2035_v48 = vor.u32 %v2034_v20, %v2033_v32 }
 0x2d5   : > { %v1595_v45 = vadd.f32 %v1585_v38, %v1478_v43  ;;  %v2096_v43 = vpack.c.bf16 %v1712_v33, %v1711_v49 }
 0x2d6   : > { %v1409_v13 = vpop.f32.mrf.mxu0 }
 0x2d7   : > { %v1699_v30 = vadd.f32 %v1689_v35, %v1595_v45  ;;  %v1482_v39 = vpop.f32.mrf.mxu1  ;;  %v1481_v16 = vadd.f32 %v1480_v42, %v1409_v13  ;;  %v2161_v45 = vshrl.u32 %v2096_v43, 16  ;;  %v2164_v13 = vshll.u32 %v2096_v43, 16 }
 0x2d8   : > { %v1692_v57 = vpop.f32.mrf.mxu3  ;;  %v2100_v39 = vrot.slane %v2096_v43, 1  ;;  %v2234_v22 = vrot.slane %v2096_v43, 2  ;;  %v3670_v43 = vld [vmem:[%s4962_s7 + $0x34] sm:$0xf0] }
 0x2d9   : > { %v4638_v53 = vadd.f32 %v4585_v11, %v1699_v30  ;;  %v2166_v50 = vrot.slane %v2164_v13, 2 }
 0x2db   : > { %v1713_v63 = vmax.f32 %v4638_v53, 0.0 }
 0x2dc   : > { %v1588_v25 = vpop.f32.mrf.mxu2 }
 0x2dd   : > { %v4646_v61 = vpack.c.bf16 %v1713_v63, %v1712_v33  ;;  %v1596_v51 = vadd.f32 %v1588_v25, %v1481_v16  ;;  %v3415_v16 = vld [vmem:[%s4962_s7 + $0x40] sm:$0xf] }
 0x2de   : > { %v1411_v56 = vpop.f32.mrf.mxu0 }
 0x2df   : > { %3198 = vmatmul.msk.bf16.gmra.mxu1 %vm451_vm0, %v4646_v61  ;;  %v1852_v28 = vrot.slane %v4646_v61, 1  ;;  %v1742_v10 = vshll.u32 %v4646_v61, 16  ;;  %v1746_v1 = vshrl.u32 %v4646_v61, 16  ;;  %v1700_v41 = vadd.f32 %v1692_v57, %v1596_v51  ;;  %v3671_v51 = vld [vmem:[%s4962_s7 + $0x44] sm:$0xf] }
 0x2e0   : > { %v1694_v2 = vpop.f32.mrf.mxu3  ;;  %v1974_v55 = vrot.slane %v4646_v61, 3  ;;  %v2163_v57 = vrot.slane %v2161_v45, 1 }
 0x2e1   : > { %v1853_v5 = vsel %vm1850_vm6, %v1851_v17, %v1852_v28  ;;  %v1744_v6 = vrot.slane %v1742_v10, 1  ;;  %v1913_v47 = vrot.slane %v1746_v1, 2  ;;  %v1914_v7 = vrot.slane %v1742_v10, 3 }
 0x2e2   : > { %3223 = vmatmul.msk.bf16.vlgmr.msrb.gmra.mxu2 %vm451_vm0, %v1853_v5  ;;  %v2036_v15 = vrot.slane %v1746_v1, 3  ;;  %v2037_v26 = vrot.slane %v1742_v10, 4  ;;  %v1709_v36 = vadd.f32 %v4585_v11, %v1700_v41  ;;  %v3659_v11 = vld [vmem:[%s4960_s5 + $0x100] sm:$0xff]  ;;  %v1975_v60 = vsel %vm1129_vm3, %v1973_v54, %v1974_v55  ;;  %v3677_v10 = vld [vmem:[%s4962_s7 + $0x6c] sm:$0xf0] }
 0x2e3   : > { %v1745_v12 = vsel %vm714_vm2, %v1740_v58, %v1744_v6  ;;  %v1915_v23 = vor.u32 %v1914_v7, %v1913_v47  ;;  %v1748_v35 = vor.u32 %v1746_v1, %v1744_v6  ;;  %v2167_v53 = vor.u32 %v2166_v50, %v2163_v57  ;;  %v3433_v5 = vld [vmem:[%s4962_s7 + $0x70] sm:$0xf0]  ;;  %v3439_v58 = vld [vmem:[%s4962_s7 + $0x68] sm:$0xf]  ;;  %v3678_v47 = vld [vmem:[%s4962_s7 + $0x74] sm:$0xf0] }
 0x2e4   : > { %v1590_v19 = vpop.f32.mrf.mxu2  ;;  %3179 = vmatmul.msk.bf16.vlgmr.msrb.gmra.mxu0 %vm451_vm0, %v1745_v12  ;;  %v2038_v34 = vor.u32 %v2037_v26, %v2036_v15  ;;  %v1714_v42 = vmax.f32 %v1709_v36, 0.0  ;;  %v3436_v6 = vor.u32 %v3675_v4, %v3433_v5  ;;  %v3440_v7 = vor.u32 %v3678_v47, %v3439_v58  ;;  %v3423_v15 = vld [vmem:[%s4962_s7 + $0x48] sm:$0xf]  ;;  %v3385_v57 = vld [vmem:[%s4962_s7 + $0x10] sm:$0xf0] }
 0x2e5   : > { %v1916_v24 = vsel %vm941_vm1, %v1912_v14, %v1915_v23  ;;  %2271 = vmatpush.bf16.msrb.mxu0 %v3662_v21  ;;  %v3673_v19 = vld [vmem:[%s4962_s7 + $0x4c] sm:$0xf0]  ;;  %v3391_v50 = vld [vmem:[%s4962_s7 + $0x8] sm:$0xf] }
 0x2e6   : > { %3249 = vmatmul.msk.bf16.vlgmr.msrb.gmra.mxu3 %vm451_vm0, %v1916_v24  ;;  %v2039_v37 = vsel %vm2032_vm7, %v2035_v48, %v2038_v34  ;;  %v2097_v40 = vpack.c.bf16 %v1714_v42, %v1713_v63  ;;  %2417 = vmatpush.bf16.msrb.mxu2 %v3436_v6  ;;  %v3416_v14 = vor.u32 %v3673_v19, %v3415_v16  ;;  %v3417_v24 = vld [vmem:[%s4962_s7 + $0x50] sm:$0xf0]  ;;  %v3669_v48 = vld [vmem:[%s4962_s7 + $0x2c] sm:$0xf0]  ;;  %v3694_v19 = vld [vmem:[%s4964_s9 + $0x78] sm:$0xff] }
 0x2e7   : > { %2430 = vmatpush.bf16.msrb.mxu3 %v3440_v7  ;;  %v3420_v26 = vor.u32 %v3671_v51, %v3417_v24 }
 0x2e8   : > { %v2169_v38 = vshrl.u32 %v2097_v40, 16  ;;  %v2172_v44 = vshll.u32 %v2097_v40, 16  ;;  %v2101_v46 = vrot.slane %v2097_v40, 1  ;;  %v2235_v33 = vrot.slane %v2097_v40, 2  ;;  %v3407_v40 = vld [vmem:[%s4962_s7 + $0x28] sm:$0xf] }
 0x2e9   : > { %2272 = vmatpush.bf16.msrb.mxu0 %v3661_v27  ;;  %v3674_v27 = vld [vmem:[%s4962_s7 + $0x54] sm:$0xf0] }
 0x2ea   : > { %v2171_v18 = vrot.slane %v2169_v38, 1  ;;  %v2174_v30 = vrot.slane %v2172_v44, 2  ;;  %v2102_v29 = vsel %vm1850_vm6, %v2100_v39, %v2101_v46  ;;  %v2236_v63 = vsel %vm2233_vm9, %v2234_v22, %v2235_v33  ;;  %2418 = vmatpush.bf16.msrb.mxu2 %v3420_v26  ;;  %v3663_v39 = vld [vmem:[%s4962_s7 + $0x4] sm:$0xf]  ;;  %v3684_v26 = vld [vmem:[%s4964_s9 + $0x28] sm:$0xff] }
 0x2eb   : > { %v3424_v32 = vor.u32 %v3674_v27, %v3423_v15  ;;  %v3408_v38 = vor.u32 %v3670_v43, %v3407_v40  ;;  %v3388_v54 = vor.u32 %v3663_v39, %v3385_v57  ;;  %v3801_v15 = vld [vmem:[%s4961_s6] ss:$0 sm:$0xff]  ;;  %v3692_v27 = vld [vmem:[%s4964_s9 + $0x68] sm:$0xff]  ;;  %v3690_v43 = vld [vmem:[%s4964_s9 + $0x58] sm:$0xff] }
 0x2ec   : > { %v2175_v49 = vor.u32 %v2174_v30, %v2171_v18  ;;  %v3383_v18 = vld [vmem:[%s4962_s7] sm:$0xf]  ;;  %v3665_v30 = vld [vmem:[%s4962_s7 + $0xc] sm:$0xf0]  ;;  %v3708_v39 = vld [vmem:[%s4964_s9 + $0xe8] sm:$0xff] }
 0x2ed   : > { %2273 = vmatpush.bf16.msrb.mxu0 %v3660_v0  ;;  %2431 = vmatpush.bf16.msrb.mxu3 %v3424_v32  ;;  %v3401_v0 = vld [vmem:[%s4962_s7 + $0x30] sm:$0xf0] }
 0x2ee   : > { %v2176_v31 = vsel %vm2159_vm8, %v2167_v53, %v2175_v49  ;;  %v3676_v53 = vld [vmem:[%s4962_s7 + $0x6c] sm:$0xf]  ;;  %v3697_v57 = vld [vmem:[%s4964_s9 + $0x90] sm:$0xff] }
 0x2ef   : > { %3301 = vmatmul.msk.bf16.vlgmr.msra.gmra.mxu1 %vm451_vm0, %v2039_v37 }
 0x2f1   : > { %2274 = vmatpush.bf16.msrb.mxu0 %v3659_v11  ;;  %2432 = vmatpush.bf16.msrb.mxu3 %v3408_v38 }
 0x2f2   : > { %3224 = vmatmul.msk.bf16.gmra.mxu2 %vm451_vm0, %v1852_v28  ;;  %v3431_v28 = vld [vmem:[%s4962_s7 + $0x60] sm:$0xf] }
 0x2f3   : > { %v3432_v2 = vor.u32 %v3677_v10, %v3431_v28  ;;  %v3668_v10 = vld [vmem:[%s4962_s7 + $0x2c] sm:$0xf] }
 0x2f4   : > { %3180 = vmatmul.msk.bf16.gmra.mxu0 %vm451_vm0, %v1748_v35  ;;  %v3667_v35 = vld [vmem:[%s4962_s7 + $0x24] sm:$0xf] }
 0x2f5   : > { %2404 = vmatpush.bf16.msrb.mxu1 %v3432_v2  ;;  %v3404_v11 = vor.u32 %v3667_v35, %v3401_v0  ;;  %v3409_v2 = vld [vmem:[%s4962_s7 + $0x38] sm:$0xf0] }
 0x2f6   : > { %3250 = vmatmul.msk.bf16.gmra.mxu3 %vm451_vm0, %v1915_v23  ;;  %v3412_v58 = vor.u32 %v3668_v10, %v3409_v2  ;;  %v3710_v0 = vld [vmem:[%s4964_s9 + $0xf8] sm:$0xff] }
 0x2f7   : > { %2419 = vmatpush.bf16.msrb.mxu2 %v3404_v11  ;;  %v3682_v11 = vld [vmem:[%s4964_s9 + $0x18] sm:$0xff] }
 0x2f9   : > { %2405 = vmatpush.bf16.msrb.mxu1 %v3416_v14  ;;  %v3685_v14 = vld [vmem:[%s4964_s9 + $0x30] sm:$0xff] }
 0x2fb   : > { %2420 = vmatpush.bf16.msrb.mxu2 %v3388_v54  ;;  %v3688_v54 = vld [vmem:[%s4964_s9 + $0x48] sm:$0xff] }
 0x2ff   : > { %3302 = vmatmul.msk.bf16.gmra.mxu1 %vm451_vm0, %v2038_v34  ;;  %v3399_v34 = vld [vmem:[%s4962_s7 + $0x20] sm:$0xf] }
 0x300   : > { %v3400_v36 = vor.u32 %v3669_v48, %v3399_v34 }
 0x302   : > { %3327 = vmatmul.msk.bf16.vlgmr.msra.gmra.mxu2 %vm451_vm0, %v2102_v29  ;;  %2406 = vmatpush.bf16.msrb.mxu1 %v3400_v36  ;;  %v3666_v29 = vld [vmem:[%s4962_s7 + $0x14] sm:$0xf0]  ;;  %v3683_v36 = vld [vmem:[%s4964_s9 + $0x20] sm:$0xff] }
 0x303   : > { %2730 = vmatpush.bf16.msra.mxu2 %v3694_v19 }
 0x304   : > { %3275 = vmatmul.msk.bf16.vlgmr.msra.gmra.mxu0 %vm451_vm0, %v1975_v60 }
 0x306   : > { %3353 = vmatmul.msk.bf16.vlgmr.msra.gmra.mxu3 %vm451_vm0, %v2176_v31  ;;  %v3441_v31 = vld [vmem:[%s4962_s7 + $0x78] sm:$0xf0] }
 0x307   : > { %v3444_v22 = vor.u32 %v3676_v53, %v3441_v31  ;;  %v3687_v53 = vld [vmem:[%s4964_s9 + $0x40] sm:$0xff] }
 0x308   : > { %v3695_v31 = vld [vmem:[%s4964_s9 + $0x80] sm:$0xff] }
 0x312   : > { %3328 = vmatmul.msk.bf16.gmra.mxu2 %vm451_vm0, %v2101_v46 }
 0x314   : > { %3276 = vmatmul.msk.bf16.gmra.mxu0 %vm451_vm0, %v1974_v55  ;;  %v3384_v55 = vor.u32 %v3665_v30, %v3383_v18  ;;  %v3680_v30 = vld [vmem:[%s4964_s9 + $0x8] sm:$0xff] }
 0x316   : > { %3354 = vmatmul.msk.bf16.gmra.mxu3 %vm451_vm0, %v2175_v49  ;;  %v3392_v49 = vor.u32 %v3666_v29, %v3391_v50  ;;  %2407 = vmatpush.bf16.msrb.mxu1 %v3384_v55  ;;  %v3689_v55 = vld [vmem:[%s4964_s9 + $0x50] sm:$0xff]  ;;  %v3679_v50 = vld [vmem:[%s4964_s9] sm:$0xff] }
 0x317   : > { %v3707_v29 = vld [vmem:[%s4964_s9 + $0xe0] sm:$0xff] }
 0x318   : > { %2433 = vmatpush.bf16.msrb.mxu3 %v3392_v49  ;;  %v3696_v49 = vld [vmem:[%s4964_s9 + $0x88] sm:$0xff] }
 0x31a   : > { %2443 = vmatpush.bf16.msra.mxu1 %v3444_v22  ;;  %v3704_v22 = vld [vmem:[%s4964_s9 + $0xc8] sm:$0xff] }
 0x324   : > { %3379 = vmatmul.msk.bf16.vlgmr.msrb.gmra.mxu0 %vm451_vm0, %v2236_v63  ;;  %v3672_v63 = vld [vmem:[%s4962_s7 + $0x4c] sm:$0xf] }
 0x334   : > { %3380 = vmatmul.msk.bf16.gmra.mxu0 %vm451_vm0, %v2235_v33 }
 0x34c   : > { %v4703_v25 = vpop.f32.mrf.mxu1 }
 0x354   : > { %v1834_v59 = vpop.f32.mrf.mxu1 }
 0x355   : > { %v3425_v59 = vld [vmem:[%s4962_s7 + $0x58] sm:$0xf0] }
 0x35c   : > { %v1836_v61 = vpop.f32.mrf.mxu1 }
 0x35d   : > { %v3428_v61 = vor.u32 %v3672_v63, %v3425_v59  ;;  %v3703_v63 = vld [vmem:[%s4964_s9 + $0xc0] sm:$0xff] }
 0x35e   : > { %v2307_v59 = vld [vmem:[%s4963_s8] sm:$0xf] }
 0x35f   : > { %2444 = vmatpush.bf16.msra.mxu1 %v3428_v61  ;;  %v2389_v61 = vperm.slane %v2307_v59, 0  ;;  %v2390_v10 = vperm.slane %v2307_v59, 1  ;;  %v2391_v2 = vperm.slane %v2307_v59, 2 }
 0x361   : > { %v4705_v8 = vpop.f32.mrf.mxu0 }
 0x363   : > { %2445 = vmatpush.bf16.msra.mxu1 %v3412_v58 }
 0x364   : > { %v1837_v56 = vpop.f32.mrf.mxu1 }
 0x365   : > { %v4707_v52 = vpop.f32.mrf.mxu2 }
 0x369   : > { %v1790_v62 = vpop.f32.mrf.mxu0  ;;  %v4709_v17 = vpop.f32.mrf.mxu3 }
 0x36a   : > { %v1833_v62 = vadd.f32 %v4703_v25, %v4705_v8  ;;  %v3393_v25 = vld [vmem:[%s4962_s7 + $0x18] sm:$0xf0] }
 0x36c   : > { %v4717_v1 = vpop.f32.mrf.mxu1  ;;  %v1900_v4 = vadd.f32 %v4707_v52, %v1833_v62  ;;  %v3686_v52 = vld [vmem:[%s4964_s9 + $0x38] sm:$0xff] }
 0x36d   : > { %v1895_v3 = vpop.f32.mrf.mxu2  ;;  %2717 = vmatpush.bf16.msra.mxu0 %v3686_v52 }
 0x36e   : > { %v3664_v3 = vld [vmem:[%s4962_s7 + $0xc] sm:$0xf]  ;;  %v1963_v8 = vadd.f32 %v4709_v17, %v1900_v4  ;;  %v3702_v17 = vld [vmem:[%s4964_s9 + $0xb8] sm:$0xff] }
 0x36f   : > { %v3396_v6 = vor.u32 %v3664_v3, %v3393_v25  ;;  %2743 = vmatpush.bf16.msra.mxu3 %v3702_v17 }
 0x371   : > { %v1792_v9 = vpop.f32.mrf.mxu0  ;;  %v1958_v12 = vpop.f32.mrf.mxu3  ;;  %2446 = vmatpush.bf16.msra.mxu1 %v3396_v6  ;;  %2718 = vmatpush.bf16.msra.mxu0 %v3685_v14 }
 0x374   : > { %v2081_v23 = vpop.f32.mrf.mxu1 }
 0x375   : > { %v1897_v21 = vpop.f32.mrf.mxu2  ;;  %2719 = vmatpush.bf16.msra.mxu0 %v3684_v26 }
 0x376   : > { %v3701_v21 = vld [vmem:[%s4964_s9 + $0xb0] sm:$0xff] }
 0x377   : > { %2744 = vmatpush.bf16.msra.mxu3 %v3701_v21 }
 0x379   : > { %v1793_v20 = vpop.f32.mrf.mxu0  ;;  %v1960_v41 = vpop.f32.mrf.mxu3  ;;  %2720 = vmatpush.bf16.msra.mxu0 %v3683_v36 }
 0x37a   : > { %v3700_v20 = vld [vmem:[%s4964_s9 + $0xa8] sm:$0xff] }
 0x37b   : > { %2745 = vmatpush.bf16.msra.mxu3 %v3700_v20 }
 0x37c   : > { %v2083_v37 = vpop.f32.mrf.mxu1 }
 0x37d   : > { %v1898_v42 = vpop.f32.mrf.mxu2  ;;  %v3691_v37 = vld [vmem:[%s4964_s9 + $0x60] sm:$0xff]  ;;  %2721 = vmatpush.bf16.msra.mxu0 %v3682_v11 }
 0x37e   : > { %v3699_v42 = vld [vmem:[%s4964_s9 + $0xa0] sm:$0xff] }
 0x37f   : > { %2746 = vmatpush.bf16.msra.mxu3 %v3699_v42 }
 0x381   : > { %v2015_v44 = vpop.f32.mrf.mxu0  ;;  %v1961_v45 = vpop.f32.mrf.mxu3 }
 0x382   : > { %v2022_v7 = vadd.f32 %v2015_v44, %v1963_v8  ;;  %v3698_v44 = vld [vmem:[%s4964_s9 + $0x98] sm:$0xff]  ;;  %v3709_v45 = vld [vmem:[%s4964_s9 + $0xf0] sm:$0xff] }
 0x383   : > { %2747 = vmatpush.bf16.msra.mxu3 %v3698_v44 }
 0x384   : > { %v2084_v13 = vpop.f32.mrf.mxu1  ;;  %v2086_v12 = vadd.f32 %v4717_v1, %v2022_v7  ;;  %v3693_v1 = vld [vmem:[%s4964_s9 + $0x70] sm:$0xff] }
 0x385   : > { %v2142_v46 = vpop.f32.mrf.mxu2  ;;  %2731 = vmatpush.bf16.msra.mxu2 %v3693_v1  ;;  %v3681_v13 = vld [vmem:[%s4964_s9 + $0x10] sm:$0xff] }
 0x386   : > { %v2149_v51 = vadd.f32 %v2142_v46, %v2086_v12  ;;  %2722 = vmatpush.bf16.msra.mxu0 %v3681_v13  ;;  %v2392_v12 = vperm.slane %v2307_v59, 3 }
 0x387   : > { %2748 = vmatpush.bf16.msra.mxu3 %v3697_v57 }
 0x389   : > { %v2017_v60 = vpop.f32.mrf.mxu0  ;;  %v2216_v33 = vpop.f32.mrf.mxu3  ;;  %2732 = vmatpush.bf16.msra.mxu2 %v3692_v27 }
 0x38a   : > { %v2223_v24 = vadd.f32 %v2216_v33, %v2149_v51  ;;  %2723 = vmatpush.bf16.msra.mxu0 %v3680_v30  ;;  %v3706_v60 = vld [vmem:[%s4964_s9 + $0xd8] sm:$0xff]  ;;  %v3705_v33 = vld [vmem:[%s4964_s9 + $0xd0] sm:$0xff]  ;;  %v2524_v51 = vld [vmem:[%s4965_s10] sm:$0x1] }
 0x38b   : > { %2749 = vmatpush.bf16.msra.mxu3 %v3696_v49 }
 0x38d   : > { %v2144_v56 = vpop.f32.mrf.mxu2  ;;  %2733 = vmatpush.bf16.msra.mxu2 %v3691_v37 }
 0x38e   : > { %2724 = vmatpush.bf16.msra.mxu0 %v3679_v50 }
 0x38f   : > { %2750 = vmatpush.bf16.msra.mxu3 %v3695_v31 }
 0x391   : > { %v2019_v28 = vpop.f32.mrf.mxu0  ;;  %v2218_v5 = vpop.f32.mrf.mxu3  ;;  %2734 = vmatpush.bf16.msra.mxu2 %v3690_v43 }
 0x395   : > { %v2146_v47 = vpop.f32.mrf.mxu2  ;;  %2735 = vmatpush.bf16.msra.mxu2 %v3689_v55 }
 0x399   : > { %v2020_v9 = vpop.f32.mrf.mxu0  ;;  %v2220_v16 = vpop.f32.mrf.mxu3  ;;  %2736 = vmatpush.bf16.msra.mxu2 %v3688_v54 }
 0x39d   : > { %v2147_v23 = vpop.f32.mrf.mxu2  ;;  %2737 = vmatpush.bf16.msra.mxu2 %v3687_v53 }
 0x3a1   : > { %v2276_v32 = vpop.f32.mrf.mxu0  ;;  %v2221_v41 = vpop.f32.mrf.mxu3 }
 0x3a2   : > { %v2283_v34 = vadd.f32 %v2276_v32, %v2223_v24 }
 0x3a4   : > { %v2288_v48 = vadd.f32 %v3801_v15, %v2283_v34 }
 0x3a6   : > { %v2289_v35 = vmax.f32 %v2288_v48, 0.0 }
 0x3a8   : > { %v2306_v40 = vpack.c.bf16 %v2289_v35, %v2289_v35 }
 0x3a9   : > { %v2278_v38 = vpop.f32.mrf.mxu0 }
 0x3aa   : > { %3445 = vmatmul.msk.bf16.vlgmr.msrb.gmra.mxu1 %vm451_vm0, %v2306_v40  ;;  %3446 = vmatmul.msk.bf16.vlgmr.msrb.gmra.mxu2 %vm451_vm0, %v2306_v40 }
 0x3ab   : > { %3447 = vmatmul.msk.bf16.vlgmr.msrb.gmra.mxu3 %vm451_vm0, %v2306_v40  ;;  %2756 = vmatpush.bf16.msrb.mxu1 %v3710_v0 }
 0x3af   : > { %2757 = vmatpush.bf16.msrb.mxu1 %v3709_v45 }
 0x3b1   : > { %v2280_v46 = vpop.f32.mrf.mxu0 }
 0x3b3   : > { %2758 = vmatpush.bf16.msrb.mxu1 %v3708_v39 }
 0x3b7   : > { %2759 = vmatpush.bf16.msrb.mxu1 %v3707_v29 }
 0x3b9   : > { %v2281_v18 = vpop.f32.mrf.mxu0 }
 0x3ba   : > { %3448 = vmatmul.msk.bf16.vlgmr.msra.gmra.mxu1 %vm451_vm0, %v2306_v40 }
 0x3bb   : > { %2760 = vmatpush.bf16.msrb.mxu1 %v3706_v60 }
 0x3bf   : > { %2761 = vmatpush.bf16.msrb.mxu1 %v3705_v33 }
 0x3c3   : > { %2762 = vmatpush.bf16.msrb.mxu1 %v3704_v22 }
 0x3c7   : > { %2763 = vmatpush.bf16.msrb.mxu1 %v3703_v63 }
 0x427   : > { %v2409_v56 = vpop.f32.mrf.mxu1 }
 0x428   : > { %v2410_v62 = vadd.f32 %v2409_v56, %v2389_v61 }
 0x42a   : > { %v2452_v28 = vmax.f32 %v2410_v62, 0.0 }
 0x42c   : > { %v2520_v3 = vpack.c.bf16 %v2452_v28, %v2452_v28 }
 0x42d   : > { %v2422_v4 = vpop.f32.mrf.mxu2 }
 0x42e   : > { %v2423_v5 = vadd.f32 %v2422_v4, %v2390_v10  ;;  %v2435_v58 = vpop.f32.mrf.mxu3  ;;  %2725 = vmatmul.bf16.vlgmr.msra.gmra.mxu0 %v2520_v3 }
 0x42f   : > { %v2436_v25 = vadd.f32 %v2435_v58, %v2391_v2  ;;  %v2411_v8 = vpop.f32.mrf.mxu1 }
 0x430   : > { %v2453_v6 = vmax.f32 %v2423_v5, 0.0 }
 0x431   : > { %v2454_v47 = vmax.f32 %v2436_v25, 0.0 }
 0x432   : > { %v2521_v7 = vpack.c.bf16 %v2453_v6, %v2453_v6 }
 0x433   : > { %v2522_v9 = vpack.c.bf16 %v2454_v47, %v2454_v47 }
 0x434   : > { %2738 = vmatmul.bf16.vlgmr.msra.gmra.mxu2 %v2521_v7 }
 0x435   : > { %2751 = vmatmul.bf16.vlgmr.msra.gmra.mxu3 %v2522_v9  ;;  %v2424_v16 = vpop.f32.mrf.mxu2 }
 0x436   : > { %v2437_v52 = vpop.f32.mrf.mxu3 }
 0x437   : > { %v2448_v19 = vpop.f32.mrf.mxu1 }
 0x438   : > { %v2449_v17 = vadd.f32 %v2448_v19, %v2392_v12 }
 0x43a   : > { %v2455_v14 = vmax.f32 %v2449_v17, 0.0 }
 0x43c   : > { %v2523_v1 = vpack.c.bf16 %v2455_v14, %v2455_v14 }
 0x43e   : > { %2764 = vmatmul.bf16.vlgmr.msrb.gmra.mxu1 %v2523_v1 }
 0x43f   : > { %v2450_v23 = vpop.f32.mrf.mxu1 }
 0x4ab   : > { %v2726_v21 = vpop.f32.mrf.mxu0 }
 0x4ac   : > { %v2727_v15 = vadd.f32 %v2726_v21, %v2524_v51 }
 0x4b3   : > { %v2728_v24 = vpop.f32.mrf.mxu0 }
 0x4b7   : > { %v2739_v26 = vpop.f32.mrf.mxu2 }
 0x4b8   : > { %v2740_v27 = vadd.f32 %v2739_v26, %v2727_v15  ;;  %v2752_v32 = vpop.f32.mrf.mxu3 }
 0x4ba   : > { %v2753_v20 = vadd.f32 %v2752_v32, %v2740_v27 }
 0x4bb   : > { %v2765_v41 = vpop.f32.mrf.mxu1 }
 0x4bc   : > { %v2766_v34 = vadd.f32 %v2765_v41, %v2753_v20 }
 0x4be   : > { %2769 = vst [vmem:[%s378_s13] sm:$0x1] %v2766_v34 }
 0x4bf   : > { %v2741_v48 = vpop.f32.mrf.mxu2 }
 0x4c0   : > { %3829 = shalt.err (!%p3826_p3)
}
 0x4c1   : > { %3712 = dma.vmem_to_hbm [thread:$0]  (%p3967_p5), %s2782_s15, 16, %s2784_s16, %s2771_s24   ;;  %v2754_v36 = vpop.f32.mrf.mxu3 }
 0x4c3   : > { %v2767_v37 = vpop.f32.mrf.mxu1 }
 0x4c4 PF: > { %p3718_p4 = scmp.ge.s32.totalorder %s3864_s20, 2  ;;  %s2795_s14 = sand.u32 1, %s3852_s17  }
 0x4c5   : > { %s2796_s13 = scalar_lea.sflag [#allocation3], %s2795_s14 }
 0x4c6   : > { %p3715_p7 = pnand %p3718_p4, %p3971_p6 }
 0x4c8   : > { %p3716_p8 = pneg %p3715_p7 }
 0x4ca   : > { %3847 = dma.done.wait (%p3716_p8), %s2796_s13, 16  }
 0x4cb   : > { %3849 = vsyncadd (%p3716_p8), %s2796_s13, 4294967280  ;;  %p21_p5 = scmp.ge.s32.totalorder %s3954_s23, 4   ;;  %s4971_s17 = smov %s3856_s18 }
 0x4cc   : > { %s4972_s18 = smov %s3860_s19  ;;  %s4973_s19 = smov %s3965_s26 }
 0x4cd   : > { %s4974_s20 = smov %s3954_s23  ;;  %23 = sbr.rel (!%p21_p5) target bundleno = 5 (0x5), region = 113 }
 0x4d2   :  { %2801 = vsyncpa [#allocation3], 1 }
 0x4d3   :  { %2803 = vsyncpa [#allocation3 + $0x1], 1 }

</bundles_post_ra>
